<compile_context>
chip_gen: v7x
topology: tpu7x:2x2x1
jax: 0.10.0
libtpu: 0.0.40
codegen_flags: <defaults>
</compile_context>

<pallas_src>
import jax
import jax.numpy as jnp
from jax.experimental import pallas as pl
from jax.experimental.pallas import tpu as pltpu

BN_EPS = 1e-5               # torch.nn.BatchNorm1d default eps
SOFTPLUS_THRESHOLD = 20.0   # torch.nn.functional.softplus default threshold
CODE_STRUC_DIM = 1273       # hardcoded in the PyTorch module (fc4 / fc7)


def _pad128(n):
    return ((n + 127) // 128) * 128


# ------------------------------ fused kernel --------------------------------

def _vae_forward_kernel(
    # activations (unpadded)
    x_ref, code_ref, struc_ref, eps_ref,
    # encoder params
    wfc_x_ref, wfc_code_ref, wfc_struc_ref, g0_ref, be0_ref,
    w1_ref, g1_ref, be1_ref,
    w2_ref, g2_ref, be2_ref,
    wmusig_ref, bmusig_ref,
    # decoder params (w4 code/struc parts stay in HBM, DMA'd manually)
    w4t_ref, w4code_hbm, w4struc_hbm, g4_ref, be4_ref,
    w5_ref, g5_ref, be5_ref,
    w6_ref, g6_ref, be6_ref,
    w7_ref, b7_ref,
    # outputs (unpadded)
    out7_ref, mu_ref, sig_ref,
    # scratch
    w4code_buf, w4struc_buf, dma_sem,
):
    # Start the big decoder-weight DMAs right away so they overlap with the
    # encoder matmuls/BN; they are only needed at the fc4 stage.
    cp_code = pltpu.make_async_copy(w4code_hbm, w4code_buf, dma_sem.at[0])
    cp_struc = pltpu.make_async_copy(w4struc_hbm, w4struc_buf, dma_sem.at[1])
    cp_code.start()
    cp_struc.start()

    def mm(a, w_ref):
        # bf16 MXU inputs, f32 accumulation.
        return jnp.dot(a.astype(jnp.bfloat16), w_ref[...],
                       preferred_element_type=jnp.float32)

    def bn_relu(z, g_ref, b_ref):
        # BatchNorm1d (training mode): batch mean + biased variance, one pass.
        mean = jnp.mean(z, axis=0, keepdims=True)
        var = jnp.maximum(jnp.mean(z * z, axis=0, keepdims=True) - mean * mean, 0.0)
        y = (z - mean) * jax.lax.rsqrt(var + BN_EPS) * g_ref[...] + b_ref[...]
        return jnp.maximum(y, 0.0)

    code = code_ref[...]
    struc = struc_ref[...]

    # ------------------------------- encoder -------------------------------
    # fc split as x-part + code-part + struc-part (Linear bias cancels under BN).
    z1 = (mm(x_ref[...], wfc_x_ref)
          + mm(code, wfc_code_ref)
          + mm(struc, wfc_struc_ref))
    out1 = bn_relu(z1, g0_ref, be0_ref)                       # BN  + relu
    out2 = bn_relu(mm(out1, w1_ref), g1_ref, be1_ref)         # fc1 + BN1 + relu
    out3 = bn_relu(mm(out2, w2_ref), g2_ref, be2_ref)         # fc2 + BN2 + relu

    # fc3_mu | fc3_sig fused into one matmul; each half lane-padded to H3p so the
    # split below is vreg-aligned.
    fused = mm(out3, wmusig_ref) + bmusig_ref[...]
    h3p = wmusig_ref.shape[1] // 2
    h3 = mu_ref.shape[1]
    mu = fused[:, :h3]
    zs = fused[:, h3p:h3p + h3]
    # torch softplus(beta=1, threshold=20): identity above the threshold.
    sig = jnp.where(zs > SOFTPLUS_THRESHOLD, zs,
                    jnp.log1p(jnp.exp(jnp.minimum(zs, SOFTPLUS_THRESHOLD))))
    mu_ref[...] = mu
    sig_ref[...] = sig

    # sample_z: mu + exp(arg / 2) * eps, with arg = softplus(fc3_sig(.)) as in the
    # reference module.
    sample = mu + jnp.exp(sig * 0.5) * eps_ref[...]

    # ------------------------------- decoder -------------------------------
    cp_code.wait()
    cp_struc.wait()
    # fc4 split into sample-part + code-part + struc-part -> no concat needed.
    z4 = (mm(sample, w4t_ref)
          + mm(code, w4code_buf)
          + mm(struc, w4struc_buf))
    out4 = bn_relu(z4, g4_ref, be4_ref)                       # BN4 + relu
    out5 = bn_relu(mm(out4, w5_ref), g5_ref, be5_ref)         # fc5 + BN5 + relu
    out6 = bn_relu(mm(out5, w6_ref), g6_ref, be6_ref)         # fc6 + BN6 + relu
    out7_ref[...] = jax.nn.sigmoid(mm(out6, w7_ref) + b7_ref[...])   # fc7 + sigmoid


# --------------------------- parameters & packing ---------------------------

def init_params(key, input_size, hidden_sizes):
    """Deterministic torch.nn.Linear-style init (uniform +-1/sqrt(fan_in)).
    Weights stored transposed as (in_features, out_features), f32."""
    layer_dims = {
        "fc":      (input_size, hidden_sizes[0]),
        "fc1":     (hidden_sizes[0], hidden_sizes[1]),
        "fc2":     (hidden_sizes[1], hidden_sizes[2]),
        "fc3_mu":  (hidden_sizes[2], hidden_sizes[3]),
        "fc3_sig": (hidden_sizes[2], hidden_sizes[3]),
        "fc4":     (hidden_sizes[3] + CODE_STRUC_DIM, hidden_sizes[2]),
        "fc5":     (hidden_sizes[2], hidden_sizes[1]),
        "fc6":     (hidden_sizes[1], hidden_sizes[0]),
        "fc7":     (hidden_sizes[0], input_size - CODE_STRUC_DIM),
    }
    params = {}
    for name, (fan_in, fan_out) in layer_dims.items():
        key, kw, kb = jax.random.split(key, 3)
        bound = float(fan_in) ** -0.5
        params[name] = {
            "w": jax.random.uniform(kw, (fan_in, fan_out), jnp.float32, -bound, bound),
            "b": jax.random.uniform(kb, (fan_out,), jnp.float32, -bound, bound),
        }
    for name, dim in [("BN", hidden_sizes[0]), ("BN1", hidden_sizes[1]),
                      ("BN2", hidden_sizes[2]), ("BN4", hidden_sizes[2]),
                      ("BN5", hidden_sizes[1]), ("BN6", hidden_sizes[0])]:
        params[name] = {"gamma": jnp.ones((dim,), jnp.float32),
                        "beta": jnp.zeros((dim,), jnp.float32)}
    return params


def pack_params(params, input_size, hidden_sizes, code_dim):
    """Split/pad parameters into kernel operands ONCE, outside the jitted forward.
    Weights -> bf16 with output (lane) dims zero-padded to multiples of 128 where
    the result feeds another layer; contraction dims stay unpadded.  gamma/beta
    zero-padded (keeps padded lanes exactly zero through every BN+relu).
    Biases of Linear layers followed by BatchNorm are dropped (they cancel)."""
    h0, h1, h2, h3 = hidden_sizes
    x_dim = input_size - CODE_STRUC_DIM
    struc_dim = CODE_STRUC_DIM - code_dim
    H0, H1, H2, H3 = (_pad128(h) for h in hidden_sizes)

    def pw(w, rows, cols):   # pad a (in,out) weight with zeros, cast to bf16
        return jnp.pad(w, ((0, rows - w.shape[0]),
                           (0, cols - w.shape[1]))).astype(jnp.bfloat16)

    def pv(v, cols):         # pad a vector into a zero-extended (1, cols) f32 row
        return jnp.pad(v.reshape(1, -1),
                       ((0, 0), (0, cols - v.shape[0]))).astype(jnp.float32)

    wfc = params["fc"]["w"]           # (input_size, h0), column order [x|code|struc]
    w4 = params["fc4"]["w"]           # (h3 + 1273, h2), row order [sample|code|struc]

    # fused fc3 weight/bias: [wmu | wsig], each half lane-padded to H3.
    wmusig = jnp.concatenate(
        [jnp.pad(params["fc3_mu"]["w"], ((0, H2 - h2), (0, H3 - h3))),
         jnp.pad(params["fc3_sig"]["w"], ((0, H2 - h2), (0, H3 - h3)))],
        axis=1).astype(jnp.bfloat16)                      # (H2, 2*H3)
    bmusig = jnp.concatenate(
        [jnp.pad(params["fc3_mu"]["b"], (0, H3 - h3)),
         jnp.pad(params["fc3_sig"]["b"], (0, H3 - h3))]).reshape(1, -1).astype(jnp.float32)

    return dict(
        wfc_x=pw(wfc[:x_dim], x_dim, H0),
        wfc_code=pw(wfc[x_dim:x_dim + code_dim], code_dim, H0),
        wfc_struc=pw(wfc[x_dim + code_dim:], struc_dim, H0),
        g0=pv(params["BN"]["gamma"], H0), be0=pv(params["BN"]["beta"], H0),
        w1=pw(params["fc1"]["w"], H0, H1),
        g1=pv(params["BN1"]["gamma"], H1), be1=pv(params["BN1"]["beta"], H1),
        w2=pw(params["fc2"]["w"], H1, H2),
        g2=pv(params["BN2"]["gamma"], H2), be2=pv(params["BN2"]["beta"], H2),
        wmusig=wmusig, bmusig=bmusig,
        w4t=pw(w4[:h3], h3, H2),
        w4code=pw(w4[h3:h3 + code_dim], code_dim, H2),
        w4struc=pw(w4[h3 + code_dim:], struc_dim, H2),
        g4=pv(params["BN4"]["gamma"], H2), be4=pv(params["BN4"]["beta"], H2),
        w5=pw(params["fc5"]["w"], H2, H1),
        g5=pv(params["BN5"]["gamma"], H1), be5=pv(params["BN5"]["beta"], H1),
        w6=pw(params["fc6"]["w"], H1, H0),
        g6=pv(params["BN6"]["gamma"], H0), be6=pv(params["BN6"]["beta"], H0),
        w7=pw(params["fc7"]["w"], H0, x_dim),
        b7=pv(params["fc7"]["b"], x_dim),
    )


_ARG_ORDER = ("wfc_x", "wfc_code", "wfc_struc", "g0", "be0",
              "w1", "g1", "be1",
              "w2", "g2", "be2",
              "wmusig", "bmusig",
              "w4t", "w4code", "w4struc", "g4", "be4",
              "w5", "g5", "be5",
              "w6", "g6", "be6",
              "w7", "b7")
_HBM_ARGS = ("w4code", "w4struc")   # overlapped via manual DMA

_VMEM_SPEC = pl.BlockSpec(memory_space=pltpu.MemorySpace.VMEM)
_ANY_SPEC = pl.BlockSpec(memory_space=pl.ANY)


def feed_forward_forward(packed, x, code, struc, eps):
    """Fused forward: one pallas_call for the whole encoder+sample+decoder.
    No wrapper-side concat/pad/slice ops; inputs and outputs are unpadded."""
    B = x.shape[0]
    x_dim = packed["w7"].shape[1]
    h3 = eps.shape[1]

    args = [x, code, struc, eps] + [packed[k] for k in _ARG_ORDER]
    in_specs = [_VMEM_SPEC] * 4 + [
        _ANY_SPEC if k in _HBM_ARGS else _VMEM_SPEC for k in _ARG_ORDER]

    return pl.pallas_call(
        _vae_forward_kernel,
        out_shape=(jax.ShapeDtypeStruct((B, x_dim), jnp.float32),
                   jax.ShapeDtypeStruct((B, h3), jnp.float32),
                   jax.ShapeDtypeStruct((B, h3), jnp.float32)),
        in_specs=in_specs,
        out_specs=(_VMEM_SPEC, _VMEM_SPEC, _VMEM_SPEC),
        scratch_shapes=[
            pltpu.VMEM(packed["w4code"].shape, jnp.bfloat16),
            pltpu.VMEM(packed["w4struc"].shape, jnp.bfloat16),
            pltpu.SemaphoreType.DMA((2,)),
        ],
        compiler_params=pltpu.CompilerParams(
            vmem_limit_bytes=32 * 1024 * 1024),   # <= 64 MiB physical on v7x
    )(*args)


# ----------------------------------- main -----------------------------------

if __name__ == "__main__":
    batch = 8
    code_dim, struc_dim = 1000, 273            # code + struc = 1273 (hardcoded)
    x_dim = 32
    input_size = x_dim + code_dim + struc_dim  # 1305
    hidden_sizes = [128, 96, 64, 32]

    key = jax.random.PRNGKey(0)
    kp, kx, kc, ks, ke = jax.random.split(key, 5)
    params = init_params(kp, input_size, hidden_sizes)
    packed = pack_params(params, input_size, hidden_sizes, code_dim)  # pack once

    x = jax.random.normal(kx, (batch, x_dim), jnp.float32)
    code = jax.random.normal(kc, (batch, code_dim), jnp.float32)
    struc = jax.random.normal(ks, (batch, struc_dim), jnp.float32)
    # torch.randn inside sample_z -> explicit deterministic eps here.
    eps = jax.random.normal(ke, (batch, hidden_sizes[-1]), jnp.float32)

    fwd = jax.jit(feed_forward_forward)
    out7, mu, sig = fwd(packed, x, code, struc, eps)
    jax.block_until_ready((out7, mu, sig))

    assert out7.shape == (batch, input_size - CODE_STRUC_DIM)
    assert mu.shape == (batch, hidden_sizes[-1])
    assert sig.shape == (batch, hidden_sizes[-1])
    assert bool(jnp.all(jnp.isfinite(out7)))
    assert bool(jnp.all(jnp.isfinite(mu)))
    assert bool(jnp.all(jnp.isfinite(sig)))
    assert bool(jnp.all((out7 >= 0.0) & (out7 <= 1.0)))
    assert bool(jnp.all(sig >= 0.0))
    print("KERNEL_OK")
</pallas_src>

<mosaic_0001>
module attributes {stable_mosaic.version = 11 : i64} {
  func.func @_vae_forward_kernel(%arg0: memref<8x32xf32, #tpu.memory_space<vmem>>, %arg1: memref<8x1000xf32, #tpu.memory_space<vmem>>, %arg2: memref<8x273xf32, #tpu.memory_space<vmem>>, %arg3: memref<8x32xf32, #tpu.memory_space<vmem>>, %arg4: memref<32x128xbf16, #tpu.memory_space<vmem>>, %arg5: memref<1000x128xbf16, #tpu.memory_space<vmem>>, %arg6: memref<273x128xbf16, #tpu.memory_space<vmem>>, %arg7: memref<1x128xf32, #tpu.memory_space<vmem>>, %arg8: memref<1x128xf32, #tpu.memory_space<vmem>>, %arg9: memref<128x128xbf16, #tpu.memory_space<vmem>>, %arg10: memref<1x128xf32, #tpu.memory_space<vmem>>, %arg11: memref<1x128xf32, #tpu.memory_space<vmem>>, %arg12: memref<128x128xbf16, #tpu.memory_space<vmem>>, %arg13: memref<1x128xf32, #tpu.memory_space<vmem>>, %arg14: memref<1x128xf32, #tpu.memory_space<vmem>>, %arg15: memref<128x256xbf16, #tpu.memory_space<vmem>>, %arg16: memref<1x256xf32, #tpu.memory_space<vmem>>, %arg17: memref<32x128xbf16, #tpu.memory_space<vmem>>, %arg18: memref<1000x128xbf16, #tpu.memory_space<any>>, %arg19: memref<273x128xbf16, #tpu.memory_space<any>>, %arg20: memref<1x128xf32, #tpu.memory_space<vmem>>, %arg21: memref<1x128xf32, #tpu.memory_space<vmem>>, %arg22: memref<128x128xbf16, #tpu.memory_space<vmem>>, %arg23: memref<1x128xf32, #tpu.memory_space<vmem>>, %arg24: memref<1x128xf32, #tpu.memory_space<vmem>>, %arg25: memref<128x128xbf16, #tpu.memory_space<vmem>>, %arg26: memref<1x128xf32, #tpu.memory_space<vmem>>, %arg27: memref<1x128xf32, #tpu.memory_space<vmem>>, %arg28: memref<128x32xbf16, #tpu.memory_space<vmem>>, %arg29: memref<1x32xf32, #tpu.memory_space<vmem>>, %arg30: memref<8x32xf32, #tpu.memory_space<vmem>>, %arg31: memref<8x32xf32, #tpu.memory_space<vmem>>, %arg32: memref<8x32xf32, #tpu.memory_space<vmem>>, %arg33: memref<1000x128xbf16, #tpu.memory_space<vmem>>, %arg34: memref<273x128xbf16, #tpu.memory_space<vmem>>, %arg35: memref<2x!tpu.dma_semaphore, #tpu.memory_space<semaphore_mem>>) attributes {dimension_semantics = [], scalar_prefetch = 0 : i64, scratch_operands = 3 : i64, tpu.core_type = #tpu.core_type<tc>} {
    %c0_i32 = arith.constant 0 : i32
    %0 = tpu.memref_slice %arg35[%c0_i32] : memref<2x!tpu.dma_semaphore, #tpu.memory_space<semaphore_mem>> -> memref<1x!tpu.dma_semaphore, #tpu.memory_space<semaphore_mem>>
    %1 = tpu.memref_squeeze %0 : memref<1x!tpu.dma_semaphore, #tpu.memory_space<semaphore_mem>> -> memref<!tpu.dma_semaphore, #tpu.memory_space<semaphore_mem>>
    tpu.enqueue_dma source(%arg18 : memref<1000x128xbf16, #tpu.memory_space<any>>) target(%arg33 : memref<1000x128xbf16, #tpu.memory_space<vmem>>) target_semaphore(%1 : memref<!tpu.dma_semaphore, #tpu.memory_space<semaphore_mem>>)
    %c1_i32 = arith.constant 1 : i32
    %2 = tpu.memref_slice %arg35[%c1_i32] : memref<2x!tpu.dma_semaphore, #tpu.memory_space<semaphore_mem>> -> memref<1x!tpu.dma_semaphore, #tpu.memory_space<semaphore_mem>>
    %3 = tpu.memref_squeeze %2 : memref<1x!tpu.dma_semaphore, #tpu.memory_space<semaphore_mem>> -> memref<!tpu.dma_semaphore, #tpu.memory_space<semaphore_mem>>
    tpu.enqueue_dma source(%arg19 : memref<273x128xbf16, #tpu.memory_space<any>>) target(%arg34 : memref<273x128xbf16, #tpu.memory_space<vmem>>) target_semaphore(%3 : memref<!tpu.dma_semaphore, #tpu.memory_space<semaphore_mem>>)
    %c0 = arith.constant 0 : index
    %c0_0 = arith.constant 0 : index
    %4 = vector.load %arg1[%c0, %c0_0] : memref<8x1000xf32, #tpu.memory_space<vmem>>, vector<8x1000xf32>
    %c0_1 = arith.constant 0 : index
    %c0_2 = arith.constant 0 : index
    %5 = vector.load %arg2[%c0_1, %c0_2] : memref<8x273xf32, #tpu.memory_space<vmem>>, vector<8x273xf32>
    %c0_3 = arith.constant 0 : index
    %c0_4 = arith.constant 0 : index
    %6 = vector.load %arg0[%c0_3, %c0_4] : memref<8x32xf32, #tpu.memory_space<vmem>>, vector<8x32xf32>
    %7 = arith.truncf %6 : vector<8x32xf32> to vector<8x32xbf16>
    %c0_5 = arith.constant 0 : index
    %c0_6 = arith.constant 0 : index
    %8 = vector.load %arg4[%c0_5, %c0_6] : memref<32x128xbf16, #tpu.memory_space<vmem>>, vector<32x128xbf16>
    %cst = arith.constant dense<0.000000e+00> : vector<8x128xf32>
    %9 = tpu.matmul %7, %8, %cst {dimension_numbers = #tpu.dot_dimension_numbers<[1], [0], [0], [1], [0, 0, 1, 1], [], []>} : vector<8x32xbf16>, vector<32x128xbf16>, vector<8x128xf32> -> vector<8x128xf32>
    %10 = arith.truncf %4 : vector<8x1000xf32> to vector<8x1000xbf16>
    %c0_7 = arith.constant 0 : index
    %c0_8 = arith.constant 0 : index
    %11 = vector.load %arg5[%c0_7, %c0_8] : memref<1000x128xbf16, #tpu.memory_space<vmem>>, vector<1000x128xbf16>
    %cst_9 = arith.constant dense<0.000000e+00> : vector<8x128xf32>
    %12 = tpu.matmul %10, %11, %cst_9 {dimension_numbers = #tpu.dot_dimension_numbers<[1], [0], [0], [1], [0, 0, 1, 1], [], []>} : vector<8x1000xbf16>, vector<1000x128xbf16>, vector<8x128xf32> -> vector<8x128xf32>
    %13 = arith.addf %9, %12 : vector<8x128xf32>
    %14 = arith.truncf %5 : vector<8x273xf32> to vector<8x273xbf16>
    %c0_10 = arith.constant 0 : index
    %c0_11 = arith.constant 0 : index
    %15 = vector.load %arg6[%c0_10, %c0_11] : memref<273x128xbf16, #tpu.memory_space<vmem>>, vector<273x128xbf16>
    %cst_12 = arith.constant dense<0.000000e+00> : vector<8x128xf32>
    %16 = tpu.matmul %14, %15, %cst_12 {dimension_numbers = #tpu.dot_dimension_numbers<[1], [0], [0], [1], [0, 0, 1, 1], [], []>} : vector<8x273xbf16>, vector<273x128xbf16>, vector<8x128xf32> -> vector<8x128xf32>
    %17 = arith.addf %13, %16 : vector<8x128xf32>
    %cst_13 = arith.constant dense<0.000000e+00> : vector<128xf32>
    %18 = vector.multi_reduction <add>, %17, %cst_13 [0] : vector<8x128xf32> to vector<128xf32>
    %19 = vector.shape_cast %18 : vector<128xf32> to vector<1x128xf32>
    %cst_14 = arith.constant 8.000000e+00 : f32
    %20 = vector.broadcast %cst_14 : f32 to vector<1x128xf32>
    %21 = arith.divf %19, %20 : vector<1x128xf32>
    %22 = arith.mulf %17, %17 : vector<8x128xf32>
    %cst_15 = arith.constant dense<0.000000e+00> : vector<128xf32>
    %23 = vector.multi_reduction <add>, %22, %cst_15 [0] : vector<8x128xf32> to vector<128xf32>
    %24 = vector.shape_cast %23 : vector<128xf32> to vector<1x128xf32>
    %cst_16 = arith.constant 8.000000e+00 : f32
    %25 = vector.broadcast %cst_16 : f32 to vector<1x128xf32>
    %26 = arith.divf %24, %25 : vector<1x128xf32>
    %27 = arith.mulf %21, %21 : vector<1x128xf32>
    %28 = arith.subf %26, %27 : vector<1x128xf32>
    %cst_17 = arith.constant 0.000000e+00 : f32
    %29 = vector.broadcast %cst_17 : f32 to vector<1x128xf32>
    %30 = arith.maximumf %28, %29 : vector<1x128xf32>
    %31 = vector.broadcast %21 : vector<1x128xf32> to vector<8x128xf32>
    %32 = arith.subf %17, %31 : vector<8x128xf32>
    %cst_18 = arith.constant 9.99999974E-6 : f32
    %33 = vector.broadcast %cst_18 : f32 to vector<1x128xf32>
    %34 = arith.addf %30, %33 : vector<1x128xf32>
    %35 = math.rsqrt %34 : vector<1x128xf32>
    %36 = vector.broadcast %35 : vector<1x128xf32> to vector<8x128xf32>
    %37 = arith.mulf %32, %36 : vector<8x128xf32>
    %c0_19 = arith.constant 0 : index
    %c0_20 = arith.constant 0 : index
    %38 = vector.load %arg7[%c0_19, %c0_20] : memref<1x128xf32, #tpu.memory_space<vmem>>, vector<1x128xf32>
    %39 = vector.broadcast %38 : vector<1x128xf32> to vector<8x128xf32>
    %40 = arith.mulf %37, %39 : vector<8x128xf32>
    %c0_21 = arith.constant 0 : index
    %c0_22 = arith.constant 0 : index
    %41 = vector.load %arg8[%c0_21, %c0_22] : memref<1x128xf32, #tpu.memory_space<vmem>>, vector<1x128xf32>
    %42 = vector.broadcast %41 : vector<1x128xf32> to vector<8x128xf32>
    %43 = arith.addf %40, %42 : vector<8x128xf32>
    %cst_23 = arith.constant 0.000000e+00 : f32
    %44 = vector.broadcast %cst_23 : f32 to vector<8x128xf32>
    %45 = arith.maximumf %43, %44 : vector<8x128xf32>
    %46 = arith.truncf %45 : vector<8x128xf32> to vector<8x128xbf16>
    %c0_24 = arith.constant 0 : index
    %c0_25 = arith.constant 0 : index
    %47 = vector.load %arg9[%c0_24, %c0_25] : memref<128x128xbf16, #tpu.memory_space<vmem>>, vector<128x128xbf16>
    %cst_26 = arith.constant dense<0.000000e+00> : vector<8x128xf32>
    %48 = tpu.matmul %46, %47, %cst_26 {dimension_numbers = #tpu.dot_dimension_numbers<[1], [0], [0], [1], [0, 0, 1, 1], [], []>} : vector<8x128xbf16>, vector<128x128xbf16>, vector<8x128xf32> -> vector<8x128xf32>
    %cst_27 = arith.constant dense<0.000000e+00> : vector<128xf32>
    %49 = vector.multi_reduction <add>, %48, %cst_27 [0] : vector<8x128xf32> to vector<128xf32>
    %50 = vector.shape_cast %49 : vector<128xf32> to vector<1x128xf32>
    %cst_28 = arith.constant 8.000000e+00 : f32
    %51 = vector.broadcast %cst_28 : f32 to vector<1x128xf32>
    %52 = arith.divf %50, %51 : vector<1x128xf32>
    %53 = arith.mulf %48, %48 : vector<8x128xf32>
    %cst_29 = arith.constant dense<0.000000e+00> : vector<128xf32>
    %54 = vector.multi_reduction <add>, %53, %cst_29 [0] : vector<8x128xf32> to vector<128xf32>
    %55 = vector.shape_cast %54 : vector<128xf32> to vector<1x128xf32>
    %cst_30 = arith.constant 8.000000e+00 : f32
    %56 = vector.broadcast %cst_30 : f32 to vector<1x128xf32>
    %57 = arith.divf %55, %56 : vector<1x128xf32>
    %58 = arith.mulf %52, %52 : vector<1x128xf32>
    %59 = arith.subf %57, %58 : vector<1x128xf32>
    %cst_31 = arith.constant 0.000000e+00 : f32
    %60 = vector.broadcast %cst_31 : f32 to vector<1x128xf32>
    %61 = arith.maximumf %59, %60 : vector<1x128xf32>
    %62 = vector.broadcast %52 : vector<1x128xf32> to vector<8x128xf32>
    %63 = arith.subf %48, %62 : vector<8x128xf32>
    %cst_32 = arith.constant 9.99999974E-6 : f32
    %64 = vector.broadcast %cst_32 : f32 to vector<1x128xf32>
    %65 = arith.addf %61, %64 : vector<1x128xf32>
    %66 = math.rsqrt %65 : vector<1x128xf32>
    %67 = vector.broadcast %66 : vector<1x128xf32> to vector<8x128xf32>
    %68 = arith.mulf %63, %67 : vector<8x128xf32>
    %c0_33 = arith.constant 0 : index
    %c0_34 = arith.constant 0 : index
    %69 = vector.load %arg10[%c0_33, %c0_34] : memref<1x128xf32, #tpu.memory_space<vmem>>, vector<1x128xf32>
    %70 = vector.broadcast %69 : vector<1x128xf32> to vector<8x128xf32>
    %71 = arith.mulf %68, %70 : vector<8x128xf32>
    %c0_35 = arith.constant 0 : index
    %c0_36 = arith.constant 0 : index
    %72 = vector.load %arg11[%c0_35, %c0_36] : memref<1x128xf32, #tpu.memory_space<vmem>>, vector<1x128xf32>
    %73 = vector.broadcast %72 : vector<1x128xf32> to vector<8x128xf32>
    %74 = arith.addf %71, %73 : vector<8x128xf32>
    %cst_37 = arith.constant 0.000000e+00 : f32
    %75 = vector.broadcast %cst_37 : f32 to vector<8x128xf32>
    %76 = arith.maximumf %74, %75 : vector<8x128xf32>
    %77 = arith.truncf %76 : vector<8x128xf32> to vector<8x128xbf16>
    %c0_38 = arith.constant 0 : index
    %c0_39 = arith.constant 0 : index
    %78 = vector.load %arg12[%c0_38, %c0_39] : memref<128x128xbf16, #tpu.memory_space<vmem>>, vector<128x128xbf16>
    %cst_40 = arith.constant dense<0.000000e+00> : vector<8x128xf32>
    %79 = tpu.matmul %77, %78, %cst_40 {dimension_numbers = #tpu.dot_dimension_numbers<[1], [0], [0], [1], [0, 0, 1, 1], [], []>} : vector<8x128xbf16>, vector<128x128xbf16>, vector<8x128xf32> -> vector<8x128xf32>
    %cst_41 = arith.constant dense<0.000000e+00> : vector<128xf32>
    %80 = vector.multi_reduction <add>, %79, %cst_41 [0] : vector<8x128xf32> to vector<128xf32>
    %81 = vector.shape_cast %80 : vector<128xf32> to vector<1x128xf32>
    %cst_42 = arith.constant 8.000000e+00 : f32
    %82 = vector.broadcast %cst_42 : f32 to vector<1x128xf32>
    %83 = arith.divf %81, %82 : vector<1x128xf32>
    %84 = arith.mulf %79, %79 : vector<8x128xf32>
    %cst_43 = arith.constant dense<0.000000e+00> : vector<128xf32>
    %85 = vector.multi_reduction <add>, %84, %cst_43 [0] : vector<8x128xf32> to vector<128xf32>
    %86 = vector.shape_cast %85 : vector<128xf32> to vector<1x128xf32>
    %cst_44 = arith.constant 8.000000e+00 : f32
    %87 = vector.broadcast %cst_44 : f32 to vector<1x128xf32>
    %88 = arith.divf %86, %87 : vector<1x128xf32>
    %89 = arith.mulf %83, %83 : vector<1x128xf32>
    %90 = arith.subf %88, %89 : vector<1x128xf32>
    %cst_45 = arith.constant 0.000000e+00 : f32
    %91 = vector.broadcast %cst_45 : f32 to vector<1x128xf32>
    %92 = arith.maximumf %90, %91 : vector<1x128xf32>
    %93 = vector.broadcast %83 : vector<1x128xf32> to vector<8x128xf32>
    %94 = arith.subf %79, %93 : vector<8x128xf32>
    %cst_46 = arith.constant 9.99999974E-6 : f32
    %95 = vector.broadcast %cst_46 : f32 to vector<1x128xf32>
    %96 = arith.addf %92, %95 : vector<1x128xf32>
    %97 = math.rsqrt %96 : vector<1x128xf32>
    %98 = vector.broadcast %97 : vector<1x128xf32> to vector<8x128xf32>
    %99 = arith.mulf %94, %98 : vector<8x128xf32>
    %c0_47 = arith.constant 0 : index
    %c0_48 = arith.constant 0 : index
    %100 = vector.load %arg13[%c0_47, %c0_48] : memref<1x128xf32, #tpu.memory_space<vmem>>, vector<1x128xf32>
    %101 = vector.broadcast %100 : vector<1x128xf32> to vector<8x128xf32>
    %102 = arith.mulf %99, %101 : vector<8x128xf32>
    %c0_49 = arith.constant 0 : index
    %c0_50 = arith.constant 0 : index
    %103 = vector.load %arg14[%c0_49, %c0_50] : memref<1x128xf32, #tpu.memory_space<vmem>>, vector<1x128xf32>
    %104 = vector.broadcast %103 : vector<1x128xf32> to vector<8x128xf32>
    %105 = arith.addf %102, %104 : vector<8x128xf32>
    %cst_51 = arith.constant 0.000000e+00 : f32
    %106 = vector.broadcast %cst_51 : f32 to vector<8x128xf32>
    %107 = arith.maximumf %105, %106 : vector<8x128xf32>
    %108 = arith.truncf %107 : vector<8x128xf32> to vector<8x128xbf16>
    %c0_52 = arith.constant 0 : index
    %c0_53 = arith.constant 0 : index
    %109 = vector.load %arg15[%c0_52, %c0_53] : memref<128x256xbf16, #tpu.memory_space<vmem>>, vector<128x256xbf16>
    %cst_54 = arith.constant dense<0.000000e+00> : vector<8x256xf32>
    %110 = tpu.matmul %108, %109, %cst_54 {dimension_numbers = #tpu.dot_dimension_numbers<[1], [0], [0], [1], [0, 0, 1, 1], [], []>} : vector<8x128xbf16>, vector<128x256xbf16>, vector<8x256xf32> -> vector<8x256xf32>
    %c0_55 = arith.constant 0 : index
    %c0_56 = arith.constant 0 : index
    %111 = vector.load %arg16[%c0_55, %c0_56] : memref<1x256xf32, #tpu.memory_space<vmem>>, vector<1x256xf32>
    %112 = vector.broadcast %111 : vector<1x256xf32> to vector<8x256xf32>
    %113 = arith.addf %110, %112 : vector<8x256xf32>
    %114 = vector.extract_strided_slice %113 {offsets = [0, 0], sizes = [8, 32], strides = [1, 1]} : vector<8x256xf32> to vector<8x32xf32>
    %115 = vector.extract_strided_slice %113 {offsets = [0, 128], sizes = [8, 32], strides = [1, 1]} : vector<8x256xf32> to vector<8x32xf32>
    %cst_57 = arith.constant 2.000000e+01 : f32
    %116 = vector.broadcast %cst_57 : f32 to vector<8x32xf32>
    %117 = arith.cmpf ogt, %115, %116 : vector<8x32xf32>
    %cst_58 = arith.constant 2.000000e+01 : f32
    %118 = vector.broadcast %cst_58 : f32 to vector<8x32xf32>
    %119 = arith.minimumf %115, %118 : vector<8x32xf32>
    %120 = math.exp %119 : vector<8x32xf32>
    %121 = math.log1p %120 : vector<8x32xf32>
    %122 = arith.select %117, %115, %121 : vector<8x32xi1>, vector<8x32xf32>
    %c0_59 = arith.constant 0 : index
    %c0_60 = arith.constant 0 : index
    %123 = vector.load %arg31[%c0_59, %c0_60] : memref<8x32xf32, #tpu.memory_space<vmem>>, vector<8x32xf32>
    tpu.vector_store %arg31[%c0_59, %c0_60], %114 {strides = array<i32>} : memref<8x32xf32, #tpu.memory_space<vmem>>, vector<8x32xf32>,
    %c0_61 = arith.constant 0 : index
    %c0_62 = arith.constant 0 : index
    %124 = vector.load %arg32[%c0_61, %c0_62] : memref<8x32xf32, #tpu.memory_space<vmem>>, vector<8x32xf32>
    tpu.vector_store %arg32[%c0_61, %c0_62], %122 {strides = array<i32>} : memref<8x32xf32, #tpu.memory_space<vmem>>, vector<8x32xf32>,
    %cst_63 = arith.constant 5.000000e-01 : f32
    %125 = vector.broadcast %cst_63 : f32 to vector<8x32xf32>
    %126 = arith.mulf %122, %125 : vector<8x32xf32>
    %127 = math.exp %126 : vector<8x32xf32>
    %c0_64 = arith.constant 0 : index
    %c0_65 = arith.constant 0 : index
    %128 = vector.load %arg3[%c0_64, %c0_65] : memref<8x32xf32, #tpu.memory_space<vmem>>, vector<8x32xf32>
    %129 = arith.mulf %127, %128 : vector<8x32xf32>
    %130 = arith.addf %114, %129 : vector<8x32xf32>
    %c0_i32_66 = arith.constant 0 : i32
    %131 = tpu.memref_slice %arg35[%c0_i32_66] : memref<2x!tpu.dma_semaphore, #tpu.memory_space<semaphore_mem>> -> memref<1x!tpu.dma_semaphore, #tpu.memory_space<semaphore_mem>>
    %132 = tpu.memref_squeeze %131 : memref<1x!tpu.dma_semaphore, #tpu.memory_space<semaphore_mem>> -> memref<!tpu.dma_semaphore, #tpu.memory_space<semaphore_mem>>
    tpu.wait_dma2 semaphore(%132 : memref<!tpu.dma_semaphore, #tpu.memory_space<semaphore_mem>>) src(%arg18 : memref<1000x128xbf16, #tpu.memory_space<any>>) dst(%arg33 : memref<1000x128xbf16, #tpu.memory_space<vmem>>)
    %c1_i32_67 = arith.constant 1 : i32
    %133 = tpu.memref_slice %arg35[%c1_i32_67] : memref<2x!tpu.dma_semaphore, #tpu.memory_space<semaphore_mem>> -> memref<1x!tpu.dma_semaphore, #tpu.memory_space<semaphore_mem>>
    %134 = tpu.memref_squeeze %133 : memref<1x!tpu.dma_semaphore, #tpu.memory_space<semaphore_mem>> -> memref<!tpu.dma_semaphore, #tpu.memory_space<semaphore_mem>>
    tpu.wait_dma2 semaphore(%134 : memref<!tpu.dma_semaphore, #tpu.memory_space<semaphore_mem>>) src(%arg19 : memref<273x128xbf16, #tpu.memory_space<any>>) dst(%arg34 : memref<273x128xbf16, #tpu.memory_space<vmem>>)
    %135 = arith.truncf %130 : vector<8x32xf32> to vector<8x32xbf16>
    %c0_68 = arith.constant 0 : index
    %c0_69 = arith.constant 0 : index
    %136 = vector.load %arg17[%c0_68, %c0_69] : memref<32x128xbf16, #tpu.memory_space<vmem>>, vector<32x128xbf16>
    %cst_70 = arith.constant dense<0.000000e+00> : vector<8x128xf32>
    %137 = tpu.matmul %135, %136, %cst_70 {dimension_numbers = #tpu.dot_dimension_numbers<[1], [0], [0], [1], [0, 0, 1, 1], [], []>} : vector<8x32xbf16>, vector<32x128xbf16>, vector<8x128xf32> -> vector<8x128xf32>
    %138 = arith.truncf %4 : vector<8x1000xf32> to vector<8x1000xbf16>
    %c0_71 = arith.constant 0 : index
    %c0_72 = arith.constant 0 : index
    %139 = vector.load %arg33[%c0_71, %c0_72] : memref<1000x128xbf16, #tpu.memory_space<vmem>>, vector<1000x128xbf16>
    %cst_73 = arith.constant dense<0.000000e+00> : vector<8x128xf32>
    %140 = tpu.matmul %138, %139, %cst_73 {dimension_numbers = #tpu.dot_dimension_numbers<[1], [0], [0], [1], [0, 0, 1, 1], [], []>} : vector<8x1000xbf16>, vector<1000x128xbf16>, vector<8x128xf32> -> vector<8x128xf32>
    %141 = arith.addf %137, %140 : vector<8x128xf32>
    %142 = arith.truncf %5 : vector<8x273xf32> to vector<8x273xbf16>
    %c0_74 = arith.constant 0 : index
    %c0_75 = arith.constant 0 : index
    %143 = vector.load %arg34[%c0_74, %c0_75] : memref<273x128xbf16, #tpu.memory_space<vmem>>, vector<273x128xbf16>
    %cst_76 = arith.constant dense<0.000000e+00> : vector<8x128xf32>
    %144 = tpu.matmul %142, %143, %cst_76 {dimension_numbers = #tpu.dot_dimension_numbers<[1], [0], [0], [1], [0, 0, 1, 1], [], []>} : vector<8x273xbf16>, vector<273x128xbf16>, vector<8x128xf32> -> vector<8x128xf32>
    %145 = arith.addf %141, %144 : vector<8x128xf32>
    %cst_77 = arith.constant dense<0.000000e+00> : vector<128xf32>
    %146 = vector.multi_reduction <add>, %145, %cst_77 [0] : vector<8x128xf32> to vector<128xf32>
    %147 = vector.shape_cast %146 : vector<128xf32> to vector<1x128xf32>
    %cst_78 = arith.constant 8.000000e+00 : f32
    %148 = vector.broadcast %cst_78 : f32 to vector<1x128xf32>
    %149 = arith.divf %147, %148 : vector<1x128xf32>
    %150 = arith.mulf %145, %145 : vector<8x128xf32>
    %cst_79 = arith.constant dense<0.000000e+00> : vector<128xf32>
    %151 = vector.multi_reduction <add>, %150, %cst_79 [0] : vector<8x128xf32> to vector<128xf32>
    %152 = vector.shape_cast %151 : vector<128xf32> to vector<1x128xf32>
    %cst_80 = arith.constant 8.000000e+00 : f32
    %153 = vector.broadcast %cst_80 : f32 to vector<1x128xf32>
    %154 = arith.divf %152, %153 : vector<1x128xf32>
    %155 = arith.mulf %149, %149 : vector<1x128xf32>
    %156 = arith.subf %154, %155 : vector<1x128xf32>
    %cst_81 = arith.constant 0.000000e+00 : f32
    %157 = vector.broadcast %cst_81 : f32 to vector<1x128xf32>
    %158 = arith.maximumf %156, %157 : vector<1x128xf32>
    %159 = vector.broadcast %149 : vector<1x128xf32> to vector<8x128xf32>
    %160 = arith.subf %145, %159 : vector<8x128xf32>
    %cst_82 = arith.constant 9.99999974E-6 : f32
    %161 = vector.broadcast %cst_82 : f32 to vector<1x128xf32>
    %162 = arith.addf %158, %161 : vector<1x128xf32>
    %163 = math.rsqrt %162 : vector<1x128xf32>
    %164 = vector.broadcast %163 : vector<1x128xf32> to vector<8x128xf32>
    %165 = arith.mulf %160, %164 : vector<8x128xf32>
    %c0_83 = arith.constant 0 : index
    %c0_84 = arith.constant 0 : index
    %166 = vector.load %arg20[%c0_83, %c0_84] : memref<1x128xf32, #tpu.memory_space<vmem>>, vector<1x128xf32>
    %167 = vector.broadcast %166 : vector<1x128xf32> to vector<8x128xf32>
    %168 = arith.mulf %165, %167 : vector<8x128xf32>
    %c0_85 = arith.constant 0 : index
    %c0_86 = arith.constant 0 : index
    %169 = vector.load %arg21[%c0_85, %c0_86] : memref<1x128xf32, #tpu.memory_space<vmem>>, vector<1x128xf32>
    %170 = vector.broadcast %169 : vector<1x128xf32> to vector<8x128xf32>
    %171 = arith.addf %168, %170 : vector<8x128xf32>
    %cst_87 = arith.constant 0.000000e+00 : f32
    %172 = vector.broadcast %cst_87 : f32 to vector<8x128xf32>
    %173 = arith.maximumf %171, %172 : vector<8x128xf32>
    %174 = arith.truncf %173 : vector<8x128xf32> to vector<8x128xbf16>
    %c0_88 = arith.constant 0 : index
    %c0_89 = arith.constant 0 : index
    %175 = vector.load %arg22[%c0_88, %c0_89] : memref<128x128xbf16, #tpu.memory_space<vmem>>, vector<128x128xbf16>
    %cst_90 = arith.constant dense<0.000000e+00> : vector<8x128xf32>
    %176 = tpu.matmul %174, %175, %cst_90 {dimension_numbers = #tpu.dot_dimension_numbers<[1], [0], [0], [1], [0, 0, 1, 1], [], []>} : vector<8x128xbf16>, vector<128x128xbf16>, vector<8x128xf32> -> vector<8x128xf32>
    %cst_91 = arith.constant dense<0.000000e+00> : vector<128xf32>
    %177 = vector.multi_reduction <add>, %176, %cst_91 [0] : vector<8x128xf32> to vector<128xf32>
    %178 = vector.shape_cast %177 : vector<128xf32> to vector<1x128xf32>
    %cst_92 = arith.constant 8.000000e+00 : f32
    %179 = vector.broadcast %cst_92 : f32 to vector<1x128xf32>
    %180 = arith.divf %178, %179 : vector<1x128xf32>
    %181 = arith.mulf %176, %176 : vector<8x128xf32>
    %cst_93 = arith.constant dense<0.000000e+00> : vector<128xf32>
    %182 = vector.multi_reduction <add>, %181, %cst_93 [0] : vector<8x128xf32> to vector<128xf32>
    %183 = vector.shape_cast %182 : vector<128xf32> to vector<1x128xf32>
    %cst_94 = arith.constant 8.000000e+00 : f32
    %184 = vector.broadcast %cst_94 : f32 to vector<1x128xf32>
    %185 = arith.divf %183, %184 : vector<1x128xf32>
    %186 = arith.mulf %180, %180 : vector<1x128xf32>
    %187 = arith.subf %185, %186 : vector<1x128xf32>
    %cst_95 = arith.constant 0.000000e+00 : f32
    %188 = vector.broadcast %cst_95 : f32 to vector<1x128xf32>
    %189 = arith.maximumf %187, %188 : vector<1x128xf32>
    %190 = vector.broadcast %180 : vector<1x128xf32> to vector<8x128xf32>
    %191 = arith.subf %176, %190 : vector<8x128xf32>
    %cst_96 = arith.constant 9.99999974E-6 : f32
    %192 = vector.broadcast %cst_96 : f32 to vector<1x128xf32>
    %193 = arith.addf %189, %192 : vector<1x128xf32>
    %194 = math.rsqrt %193 : vector<1x128xf32>
    %195 = vector.broadcast %194 : vector<1x128xf32> to vector<8x128xf32>
    %196 = arith.mulf %191, %195 : vector<8x128xf32>
    %c0_97 = arith.constant 0 : index
    %c0_98 = arith.constant 0 : index
    %197 = vector.load %arg23[%c0_97, %c0_98] : memref<1x128xf32, #tpu.memory_space<vmem>>, vector<1x128xf32>
    %198 = vector.broadcast %197 : vector<1x128xf32> to vector<8x128xf32>
    %199 = arith.mulf %196, %198 : vector<8x128xf32>
    %c0_99 = arith.constant 0 : index
    %c0_100 = arith.constant 0 : index
    %200 = vector.load %arg24[%c0_99, %c0_100] : memref<1x128xf32, #tpu.memory_space<vmem>>, vector<1x128xf32>
    %201 = vector.broadcast %200 : vector<1x128xf32> to vector<8x128xf32>
    %202 = arith.addf %199, %201 : vector<8x128xf32>
    %cst_101 = arith.constant 0.000000e+00 : f32
    %203 = vector.broadcast %cst_101 : f32 to vector<8x128xf32>
    %204 = arith.maximumf %202, %203 : vector<8x128xf32>
    %205 = arith.truncf %204 : vector<8x128xf32> to vector<8x128xbf16>
    %c0_102 = arith.constant 0 : index
    %c0_103 = arith.constant 0 : index
    %206 = vector.load %arg25[%c0_102, %c0_103] : memref<128x128xbf16, #tpu.memory_space<vmem>>, vector<128x128xbf16>
    %cst_104 = arith.constant dense<0.000000e+00> : vector<8x128xf32>
    %207 = tpu.matmul %205, %206, %cst_104 {dimension_numbers = #tpu.dot_dimension_numbers<[1], [0], [0], [1], [0, 0, 1, 1], [], []>} : vector<8x128xbf16>, vector<128x128xbf16>, vector<8x128xf32> -> vector<8x128xf32>
    %cst_105 = arith.constant dense<0.000000e+00> : vector<128xf32>
    %208 = vector.multi_reduction <add>, %207, %cst_105 [0] : vector<8x128xf32> to vector<128xf32>
    %209 = vector.shape_cast %208 : vector<128xf32> to vector<1x128xf32>
    %cst_106 = arith.constant 8.000000e+00 : f32
    %210 = vector.broadcast %cst_106 : f32 to vector<1x128xf32>
    %211 = arith.divf %209, %210 : vector<1x128xf32>
    %212 = arith.mulf %207, %207 : vector<8x128xf32>
    %cst_107 = arith.constant dense<0.000000e+00> : vector<128xf32>
    %213 = vector.multi_reduction <add>, %212, %cst_107 [0] : vector<8x128xf32> to vector<128xf32>
    %214 = vector.shape_cast %213 : vector<128xf32> to vector<1x128xf32>
    %cst_108 = arith.constant 8.000000e+00 : f32
    %215 = vector.broadcast %cst_108 : f32 to vector<1x128xf32>
    %216 = arith.divf %214, %215 : vector<1x128xf32>
    %217 = arith.mulf %211, %211 : vector<1x128xf32>
    %218 = arith.subf %216, %217 : vector<1x128xf32>
    %cst_109 = arith.constant 0.000000e+00 : f32
    %219 = vector.broadcast %cst_109 : f32 to vector<1x128xf32>
    %220 = arith.maximumf %218, %219 : vector<1x128xf32>
    %221 = vector.broadcast %211 : vector<1x128xf32> to vector<8x128xf32>
    %222 = arith.subf %207, %221 : vector<8x128xf32>
    %cst_110 = arith.constant 9.99999974E-6 : f32
    %223 = vector.broadcast %cst_110 : f32 to vector<1x128xf32>
    %224 = arith.addf %220, %223 : vector<1x128xf32>
    %225 = math.rsqrt %224 : vector<1x128xf32>
    %226 = vector.broadcast %225 : vector<1x128xf32> to vector<8x128xf32>
    %227 = arith.mulf %222, %226 : vector<8x128xf32>
    %c0_111 = arith.constant 0 : index
    %c0_112 = arith.constant 0 : index
    %228 = vector.load %arg26[%c0_111, %c0_112] : memref<1x128xf32, #tpu.memory_space<vmem>>, vector<1x128xf32>
    %229 = vector.broadcast %228 : vector<1x128xf32> to vector<8x128xf32>
    %230 = arith.mulf %227, %229 : vector<8x128xf32>
    %c0_113 = arith.constant 0 : index
    %c0_114 = arith.constant 0 : index
    %231 = vector.load %arg27[%c0_113, %c0_114] : memref<1x128xf32, #tpu.memory_space<vmem>>, vector<1x128xf32>
    %232 = vector.broadcast %231 : vector<1x128xf32> to vector<8x128xf32>
    %233 = arith.addf %230, %232 : vector<8x128xf32>
    %cst_115 = arith.constant 0.000000e+00 : f32
    %234 = vector.broadcast %cst_115 : f32 to vector<8x128xf32>
    %235 = arith.maximumf %233, %234 : vector<8x128xf32>
    %236 = arith.truncf %235 : vector<8x128xf32> to vector<8x128xbf16>
    %c0_116 = arith.constant 0 : index
    %c0_117 = arith.constant 0 : index
    %237 = vector.load %arg28[%c0_116, %c0_117] : memref<128x32xbf16, #tpu.memory_space<vmem>>, vector<128x32xbf16>
    %cst_118 = arith.constant dense<0.000000e+00> : vector<8x32xf32>
    %238 = tpu.matmul %236, %237, %cst_118 {dimension_numbers = #tpu.dot_dimension_numbers<[1], [0], [0], [1], [0, 0, 1, 1], [], []>} : vector<8x128xbf16>, vector<128x32xbf16>, vector<8x32xf32> -> vector<8x32xf32>
    %c0_119 = arith.constant 0 : index
    %c0_120 = arith.constant 0 : index
    %239 = vector.load %arg29[%c0_119, %c0_120] : memref<1x32xf32, #tpu.memory_space<vmem>>, vector<1x32xf32>
    %240 = vector.broadcast %239 : vector<1x32xf32> to vector<8x32xf32>
    %241 = arith.addf %238, %240 : vector<8x32xf32>
    %242 = arith.negf %241 : vector<8x32xf32>
    %243 = math.exp %242 : vector<8x32xf32>
    %cst_121 = arith.constant 1.000000e+00 : f32
    %244 = vector.broadcast %cst_121 : f32 to vector<8x32xf32>
    %245 = arith.addf %244, %243 : vector<8x32xf32>
    %246 = arith.divf %244, %245 : vector<8x32xf32>
    %c0_122 = arith.constant 0 : index
    %c0_123 = arith.constant 0 : index
    %247 = vector.load %arg30[%c0_122, %c0_123] : memref<8x32xf32, #tpu.memory_space<vmem>>, vector<8x32xf32>
    tpu.vector_store %arg30[%c0_122, %c0_123], %246 {strides = array<i32>} : memref<8x32xf32, #tpu.memory_space<vmem>>, vector<8x32xf32>,
    return
  }
}

</mosaic_0001>

<bundles_post_ra>
// kernel: feed_forward_forward.1
= control target key start
LH: loop header
LB: loop body
LE: loop exit
PB: predicated region body
PF: predicated region fallthrough
CT: control target
= control target key end

     0   :  { %s4978_s6 = smov 1   ;;  %s4979_s10 = smov 2   ;;  %s5557_s0 = inlined_call_operand.smem [shape: u32[33], index: -1, kind: input, shape index: {}] }
   0x1   :  { %s5052_s5 = sld [smem:[%s5557_s0]]   ;;  %s4980_s14 = smov 3  }
   0x2   :  { %s5057_s9 = sld [smem:[%s5557_s0 + %s4978_s6]]   ;;  %s4981_s18 = smov 4  }
   0x3   :  { %s5062_s13 = sld [smem:[%s5557_s0 + %s4979_s10]]   ;;  %s4982_s22 = smov 5  }
   0x4   :  { %s5067_s17 = sld [smem:[%s5557_s0 + %s4980_s14]]   ;;  %s4983_s26 = smov 6  }
   0x5   :  { %s5072_s21 = sld [smem:[%s5557_s0 + %s4981_s18]]   ;;  %s4984_s30 = smov 7  }
   0x6   :  { %s5077_s25 = sld [smem:[%s5557_s0 + %s4982_s22]]   ;;  %s4985_s4 = smov 8  }
   0x7   :  { %5570 = sst [smem:[#allocation66_spill]] %s5052_s5  ;;  %s4986_s10 = smov 9  }
   0x8   :  { %s5082_s29 = sld [smem:[%s5557_s0 + %s4983_s26]]   ;;  %s4987_s15 = smov 10  }
   0x9   :  { %5571 = sst [smem:[#allocation67_spill]] %s5062_s13  ;;  %s4988_s20 = smov 11  }
   0xa   :  { %5572 = sst [smem:[#allocation68_spill]] %s5067_s17  ;;  %s4989_s26 = smov 12  }
   0xb   :  { %s5087_s3 = sld [smem:[%s5557_s0 + %s4984_s30]]   ;;  %s4990_s1 = smov 13  }
   0xc   :  { %s5092_s8 = sld [smem:[%s5557_s0 + %s4985_s4]]   ;;  %s4991_s7 = smov 14  }
   0xd   :  { %s5097_s14 = sld [smem:[%s5557_s0 + %s4986_s10]]   ;;  %s4993_s22 = smov 16  }
   0xe   :  { %5573 = sst [smem:[#allocation69_spill]] %s5082_s29  ;;  %s4994_s28 = smov 17  }
   0xf   :  { %s5102_s19 = sld [smem:[%s5557_s0 + %s4987_s15]]   ;;  %s4992_s15 = smov 15  }
  0x10   :  { %s5107_s24 = sld [smem:[%s5557_s0 + %s4988_s20]]  }
  0x11   :  { %s5112_s30 = sld [smem:[%s5557_s0 + %s4989_s26]]  }
  0x12   :  { %s5117_s6 = sld [smem:[%s5557_s0 + %s4990_s1]]  }
  0x13   :  { %s5122_s12 = sld [smem:[%s5557_s0 + %s4991_s7]]   ;;  %s4995_s7 = smov 18  }
  0x14   :  { %s5127_s20 = sld [smem:[%s5557_s0 + %s4992_s15]]   ;;  %s4996_s15 = smov 19  }
  0x15   :  { %s5132_s27 = sld [smem:[%s5557_s0 + %s4993_s22]]   ;;  %s4997_s22 = smov 20  }
  0x16   :  { %s5137_s4 = sld [smem:[%s5557_s0 + %s4994_s28]]   ;;  %s4998_s28 = smov 21  }
  0x17   :  { %5574 = sst [smem:[#allocation70_spill]] %s5112_s30 }
  0x18   :  { %s5142_s17 = sld [smem:[%s5557_s0 + %s4995_s7]]   ;;  %s4999_s7 = smov 22  }
  0x19   :  { %5575 = sst [smem:[#allocation71_spill]] %s5122_s12 }
  0x1a   :  { %s5147_s5 = sld [smem:[%s5557_s0 + %s4996_s15]]   ;;  %s5000_s15 = smov 23  }
  0x1b   :  { %5576 = sst [smem:[#allocation72_spill]] %s5132_s27 }
  0x1c   :  { %5577 = sst [smem:[#allocation73_spill]] %s5137_s4 }
  0x1d   :  { %s5152_s27 = sld [smem:[%s5557_s0 + %s4997_s22]]   ;;  %s5001_s22 = smov 24  }
  0x1e   :  { %5578 = sst [smem:[#allocation74_spill]] %s5142_s17 }
  0x1f   :  { %s5157_s13 = sld [smem:[%s5557_s0 + %s4998_s28]]   ;;  %s5002_s28 = smov 25  }
  0x20   :  { %5579 = sst [smem:[#allocation75_spill]] %s5147_s5 }
  0x21   :  { %s5162_s17 = sld [smem:[%s5557_s0 + %s4999_s7]]   ;;  %s5003_s7 = smov 26  }
  0x22   :  { %s5167_s5 = sld [smem:[%s5557_s0 + %s5000_s15]]   ;;  %s5004_s15 = smov 27  }
  0x23   :  { %s5172_s29 = sld [smem:[%s5557_s0 + %s5001_s22]]   ;;  %s5005_s22 = smov 28  }
  0x24   :  { %s5182_s4 = sld [smem:[%s5557_s0 + %s5003_s7]]   ;;  %s5007_s7 = smov 30  }
  0x25   :  { %5580 = sst [smem:[#allocation76_spill]] %s5157_s13 }
  0x26   :  { %s5177_s13 = sld [smem:[%s5557_s0 + %s5002_s28]]   ;;  %s5006_s28 = smov 29  }
  0x27   :  { %s5192_s12 = sld [smem:[%s5557_s0 + %s5005_s22]]   ;;  %s5009_s22 = smov 32  }
  0x28   :  { %5581 = sst [smem:[#allocation77_spill]] %s5167_s5 }
  0x29   :  { %s5187_s5 = sld [smem:[%s5557_s0 + %s5004_s15]]   ;;  %s5008_s15 = smov 31  }
  0x2a   :  { %s5202_s30 = sld [smem:[%s5557_s0 + %s5007_s7]]  }
  0x2c   :  { %5582 = sst [smem:[#allocation78_spill]] %s5177_s13 }
  0x2d   :  { %5584 = sst [smem:[#allocation80_spill]] %s5192_s12 }
  0x2e   :  { %s5197_s13 = sld [smem:[%s5557_s0 + %s5006_s28]]  }
  0x2f   :  { %5583 = sst [smem:[#allocation79_spill]] %s5187_s5 }
  0x30   :  { %s5207_s5 = sld [smem:[%s5557_s0 + %s5008_s15]]  }
  0x31   :  { %s5212_s12 = sld [smem:[%s5557_s0 + %s5009_s22]]  }
  0x32   :  { %71 = vsyncpa [#allocation6], 0 }
  0x33   :  { %72 = vsyncpa [#allocation9], 0 }
  0x34   :  { %73 = vsyncpa [#allocation12], 0 }
  0x35   :  { %74 = vsyncpa [#allocation15], 0 }
  0x36   :  { %75 = vsyncpa [#allocation18], 0 }
  0x37   :  { %76 = vsyncpa [#allocation21], 0 }
  0x38   :  { %77 = vsyncpa [#allocation24], 0 }
  0x39   :  { %78 = vsyncpa [#allocation27], 0 }
  0x3a   :  { %79 = vsyncpa [#allocation30], 0 }
  0x3b   :  { %80 = vsyncpa [#allocation33], 0 }
  0x3c   :  { %81 = vsyncpa [#allocation36], 0 }
  0x3d   :  { %82 = vsyncpa [#allocation39], 0 }
  0x3e   :  { %83 = vsyncpa [#allocation7], 0 }
  0x3f   :  { %84 = vsyncpa [#allocation42], 0  ;;  %s5010_s28 = smov [#allocation8]   ;;  %s4352_s1 = scalar_lea.hbm %s5072_s21, 256 }
  0x40   :  { %s106_s0 = sshll.u32 %s5010_s28, 4  ;;  %p4353_p0 = scmp.ne.s32.totalorder %s5072_s21, %s4352_s1  ;;  %s107_s0 = int_to_ptr.vmem [resolvable:$true] %s106_s0 }
  0x41   :  { %p4356_p1 = scmp.lt.u32.totalorder %s4352_s1, %s5072_s21 }
  0x43   :  { %p4358_p2 = pnand %p4356_p1, %p4353_p0 }
  0x45   :  { %4361 = shalt.err (!%p4358_p2)
}
  0x46   :  { %s4362_s2 = scalar_lea.vmem %s107_s0, 256  ;;  %p4367_p4 = scmp.lt.s32.totalorder %s107_s0, %s107_s0 }
  0x47   :  { %p4363_p3 = scmp.ne.s32.totalorder %s107_s0, %s4362_s2  ;;  %p4368_p5 = scmp.lt.s32.totalorder %s4362_s2, %s4362_s2 }
  0x49   :  { %p4369_p6 = por %p4368_p5, %p4367_p4 }
  0x4b   :  { %p4370_p7 = pnand %p4369_p6, %p4363_p3 }
  0x4d   :  { %4373 = shalt.err (!%p4370_p7)
}
  0x4e   :  { %s5011_s7 = smov 64   ;;  %s5012_s10 = smov 4  }
  0x4f   :  { %112 = dma.hbm_to_vmem [thread:$0]  %s5072_s21, 256, %s107_s0, [#allocation9], %s5011_s7, %s5011_s7, %s5012_s10  }
  0x50   :  { %s5013_s11 = smov [#allocation11]   ;;  %s5014_s16 = smov [#allocation14]  }
  0x51   :  { %s133_s15 = sshll.u32 %s5013_s11, 4  ;;  %s152_s18 = sshll.u32 %s5014_s16, 4  ;;  %s134_s15 = int_to_ptr.vmem [resolvable:$true] %s133_s15  ;;  %s153_s18 = int_to_ptr.vmem [resolvable:$true] %s152_s18 }
  0x52   :  { %s4374_s22 = scalar_lea.hbm %s5087_s3, 16 }
  0x53   :  { %p4375_p8 = scmp.ne.s32.totalorder %s5087_s3, %s4374_s22  ;;  %p4378_p9 = scmp.lt.u32.totalorder %s4374_s22, %s5087_s3 }
  0x55   :  { %p4380_p10 = pnand %p4378_p9, %p4375_p8 }
  0x57   :  { %4383 = shalt.err (!%p4380_p10)
}
  0x58   :  { %s4384_s23 = scalar_lea.vmem %s134_s15, 16  ;;  %s4388_s26 = scalar_lea.vmem %s134_s15, 32 }
  0x59   :  { %p4385_p11 = scmp.ne.s32.totalorder %s134_s15, %s4384_s23  ;;  %p4389_p12 = scmp.lt.s32.totalorder %s134_s15, %s134_s15 }
  0x5a   :  { %p4390_p13 = scmp.lt.s32.totalorder %s4388_s26, %s4384_s23 }
  0x5c   :  { %p4391_p0 = por %p4390_p13, %p4389_p12 }
  0x5e   :  { %p4392_p1 = pnand %p4391_p0, %p4385_p11 }
  0x60   :  { %4395 = shalt.err (!%p4392_p1)
}
  0x61   :  { %136 = dma.hbm_to_vmem [thread:$0]  %s5087_s3, 16, %s134_s15, [#allocation12]  }
  0x62   :  { %s4396_s21 = scalar_lea.hbm %s5097_s14, 1024 }
  0x63   :  { %p4397_p2 = scmp.ne.s32.totalorder %s5097_s14, %s4396_s21  ;;  %p4400_p3 = scmp.lt.u32.totalorder %s4396_s21, %s5097_s14 }
  0x65   :  { %p4402_p4 = pnand %p4400_p3, %p4397_p2 }
  0x67   :  { %4405 = shalt.err (!%p4402_p4)
}
  0x68   :  { %s4406_s28 = scalar_lea.vmem %s153_s18, 1024  ;;  %p4411_p6 = scmp.lt.s32.totalorder %s153_s18, %s153_s18 }
  0x69   :  { %p4407_p5 = scmp.ne.s32.totalorder %s153_s18, %s4406_s28  ;;  %p4412_p7 = scmp.lt.s32.totalorder %s4406_s28, %s4406_s28 }
  0x6b   :  { %p4413_p8 = por %p4412_p7, %p4411_p6 }
  0x6d   :  { %p4414_p9 = pnand %p4413_p8, %p4407_p5 }
  0x6f   :  { %4417 = shalt.err (!%p4414_p9)
}
  0x70   :  { %158 = dma.hbm_to_vmem [thread:$0]  %s5097_s14, 1024, %s153_s18, [#allocation15], %s5011_s7, %s5011_s7, %s5012_s10  }
  0x71   :  { %s5015_s3 = smov [#allocation17]   ;;  %s5016_s1 = smov [#allocation20]  }
  0x72   :  { %s175_s0 = sshll.u32 %s5015_s3, 4  ;;  %s197_s2 = sshll.u32 %s5016_s1, 4  ;;  %s176_s0 = int_to_ptr.vmem [resolvable:$true] %s175_s0  ;;  %s198_s2 = int_to_ptr.vmem [resolvable:$true] %s197_s2 }
  0x73   :  { %s4418_s11 = scalar_lea.hbm %s5107_s24, 16 }
  0x74   :  { %p4419_p10 = scmp.ne.s32.totalorder %s5107_s24, %s4418_s11  ;;  %p4422_p11 = scmp.lt.u32.totalorder %s4418_s11, %s5107_s24 }
  0x76   :  { %p4424_p12 = pnand %p4422_p11, %p4419_p10 }
  0x78   :  { %4427 = shalt.err (!%p4424_p12)
}
  0x79   :  { %s4428_s15 = scalar_lea.vmem %s176_s0, 16  ;;  %s4432_s16 = scalar_lea.vmem %s176_s0, 32 }
  0x7a   :  { %p4429_p13 = scmp.ne.s32.totalorder %s176_s0, %s4428_s15  ;;  %p4433_p0 = scmp.lt.s32.totalorder %s176_s0, %s176_s0 }
  0x7b   :  { %p4434_p1 = scmp.lt.s32.totalorder %s4432_s16, %s4428_s15 }
  0x7d   :  { %p4435_p2 = por %p4434_p1, %p4433_p0 }
  0x7f   :  { %p4436_p3 = pnand %p4435_p2, %p4429_p13 }
  0x81   :  { %4439 = shalt.err (!%p4436_p3)
}
  0x82   :  { %178 = dma.hbm_to_vmem [thread:$0]  %s5107_s24, 16, %s176_s0, [#allocation18]  }
  0x83   :  { %s4440_s14 = scalar_lea.hbm %s5117_s6, 16 }
  0x84   :  { %p4441_p4 = scmp.ne.s32.totalorder %s5117_s6, %s4440_s14  ;;  %p4444_p5 = scmp.lt.u32.totalorder %s4440_s14, %s5117_s6 }
  0x86   :  { %p4446_p6 = pnand %p4444_p5, %p4441_p4 }
  0x88   :  { %4449 = shalt.err (!%p4446_p6)
}
  0x89   :  { %s4450_s18 = scalar_lea.vmem %s198_s2, 16  ;;  %s4454_s22 = scalar_lea.vmem %s198_s2, 32 }
  0x8a   :  { %p4451_p7 = scmp.ne.s32.totalorder %s198_s2, %s4450_s18  ;;  %p4455_p8 = scmp.lt.s32.totalorder %s198_s2, %s198_s2 }
  0x8b   :  { %p4456_p9 = scmp.lt.s32.totalorder %s4454_s22, %s4450_s18 }
  0x8d   :  { %p4457_p10 = por %p4456_p9, %p4455_p8 }
  0x8f   :  { %p4458_p11 = pnand %p4457_p10, %p4451_p7 }
  0x91   :  { %4461 = shalt.err (!%p4458_p11)
}
  0x92   :  { %200 = dma.hbm_to_vmem [thread:$0]  %s5117_s6, 16, %s198_s2, [#allocation21]  }
  0x93   :  { %s5017_s24 = smov [#allocation23]   ;;  %s4462_s26 = scalar_lea.hbm %s5127_s20, 2048 }
  0x94   :  { %s216_s23 = sshll.u32 %s5017_s24, 4  ;;  %p4463_p12 = scmp.ne.s32.totalorder %s5127_s20, %s4462_s26  ;;  %s217_s23 = int_to_ptr.vmem [resolvable:$true] %s216_s23 }
  0x95   :  { %p4466_p13 = scmp.lt.u32.totalorder %s4462_s26, %s5127_s20 }
  0x97   :  { %p4468_p0 = pnand %p4466_p13, %p4463_p12 }
  0x99   :  { %4471 = shalt.err (!%p4468_p0)
}
  0x9a   :  { %s4472_s21 = scalar_lea.vmem %s217_s23, 2048  ;;  %p4477_p2 = scmp.lt.s32.totalorder %s217_s23, %s217_s23 }
  0x9b   :  { %p4473_p1 = scmp.ne.s32.totalorder %s217_s23, %s4472_s21  ;;  %p4478_p3 = scmp.lt.s32.totalorder %s4472_s21, %s4472_s21 }
  0x9d   :  { %p4479_p4 = por %p4478_p3, %p4477_p2 }
  0x9f   :  { %p4480_p5 = pnand %p4479_p4, %p4473_p1 }
  0xa1   :  { %4483 = shalt.err (!%p4480_p5)
}
  0xa2   :  { %s5018_s28 = smov 128   ;;  %s5019_s6 = smov 8  }
  0xa3   :  { %222 = dma.hbm_to_vmem [thread:$0]  %s5127_s20, 2048, %s217_s23, [#allocation24], %s5018_s28, %s5018_s28, %s5019_s6  }
  0xa4   :  { %s5020_s3 = smov [#allocation26]   ;;  %s5021_s1 = smov [#allocation29]  }
  0xa5   :  { %s243_s0 = sshll.u32 %s5020_s3, 4  ;;  %s262_s2 = sshll.u32 %s5021_s1, 4  ;;  %s244_s0 = int_to_ptr.vmem [resolvable:$true] %s243_s0  ;;  %s5244_s2 = int_to_ptr.vmem [resolvable:$true] %s262_s2 }
  0xa6   :  { %s4484_s11 = scalar_lea.hbm %s5152_s27, 16 }
  0xa7   :  { %p4485_p6 = scmp.ne.s32.totalorder %s5152_s27, %s4484_s11  ;;  %p4488_p7 = scmp.lt.u32.totalorder %s4484_s11, %s5152_s27 }
  0xa9   :  { %p4490_p8 = pnand %p4488_p7, %p4485_p6 }
  0xab   :  { %4493 = shalt.err (!%p4490_p8)
}
  0xac   :  { %s4494_s15 = scalar_lea.vmem %s244_s0, 16  ;;  %s4498_s16 = scalar_lea.vmem %s244_s0, 32 }
  0xad   :  { %p4495_p9 = scmp.ne.s32.totalorder %s244_s0, %s4494_s15  ;;  %p4499_p10 = scmp.lt.s32.totalorder %s244_s0, %s244_s0 }
  0xae   :  { %p4500_p11 = scmp.lt.s32.totalorder %s4498_s16, %s4494_s15 }
  0xb0   :  { %p4501_p12 = por %p4500_p11, %p4499_p10 }
  0xb2   :  { %p4502_p13 = pnand %p4501_p12, %p4495_p9 }
  0xb4   :  { %4505 = shalt.err (!%p4502_p13)
}
  0xb5   :  { %246 = dma.hbm_to_vmem [thread:$0]  %s5152_s27, 16, %s244_s0, [#allocation27]  }
  0xb6   :  { %s4506_s20 = scalar_lea.hbm %s5162_s17, 1024 }
  0xb7   :  { %p4507_p0 = scmp.ne.s32.totalorder %s5162_s17, %s4506_s20  ;;  %p4510_p1 = scmp.lt.u32.totalorder %s4506_s20, %s5162_s17 }
  0xb9   :  { %p4512_p2 = pnand %p4510_p1, %p4507_p0 }
  0xbb   :  { %4515 = shalt.err (!%p4512_p2)
}
  0xbc   :  { %s4516_s14 = scalar_lea.vmem %s5244_s2, 1024  ;;  %p4521_p4 = scmp.lt.s32.totalorder %s5244_s2, %s5244_s2 }
  0xbd   :  { %p4517_p3 = scmp.ne.s32.totalorder %s5244_s2, %s4516_s14  ;;  %p4522_p5 = scmp.lt.s32.totalorder %s4516_s14, %s4516_s14 }
  0xbf   :  { %p4523_p6 = por %p4522_p5, %p4521_p4 }
  0xc1   :  { %p4524_p7 = pnand %p4523_p6, %p4517_p3 }
  0xc3   :  { %4527 = shalt.err (!%p4524_p7)
}
  0xc4   :  { %268 = dma.hbm_to_vmem [thread:$0]  %s5162_s17, 1024, %s5244_s2, [#allocation30], %s5011_s7, %s5011_s7, %s5012_s10  }
  0xc5   :  { %s5022_s27 = smov [#allocation32]   ;;  %s5023_s22 = smov [#allocation35]  }
  0xc6   :  { %s285_s18 = sshll.u32 %s5022_s27, 4  ;;  %s307_s24 = sshll.u32 %s5023_s22, 4  ;;  %s286_s18 = int_to_ptr.vmem [resolvable:$true] %s285_s18  ;;  %s308_s24 = int_to_ptr.vmem [resolvable:$true] %s307_s24 }
  0xc7   :  { %s4528_s23 = scalar_lea.hbm %s5172_s29, 16 }
  0xc8   :  { %p4529_p8 = scmp.ne.s32.totalorder %s5172_s29, %s4528_s23  ;;  %p4532_p9 = scmp.lt.u32.totalorder %s4528_s23, %s5172_s29 }
  0xca   :  { %p4534_p10 = pnand %p4532_p9, %p4529_p8 }
  0xcc   :  { %4537 = shalt.err (!%p4534_p10)
}
  0xcd   :  { %s4538_s26 = scalar_lea.vmem %s286_s18, 16  ;;  %s4542_s21 = scalar_lea.vmem %s286_s18, 32 }
  0xce   :  { %p4539_p11 = scmp.ne.s32.totalorder %s286_s18, %s4538_s26  ;;  %p4543_p12 = scmp.lt.s32.totalorder %s286_s18, %s286_s18 }
  0xcf   :  { %p4544_p13 = scmp.lt.s32.totalorder %s4542_s21, %s4538_s26 }
  0xd1   :  { %p4545_p0 = por %p4544_p13, %p4543_p12 }
  0xd3   :  { %p4546_p1 = pnand %p4545_p0, %p4539_p11 }
  0xd5   :  { %4549 = shalt.err (!%p4546_p1)
}
  0xd6   :  { %288 = dma.hbm_to_vmem [thread:$0]  %s5172_s29, 16, %s286_s18, [#allocation33]  }
  0xd7   :  { %s4550_s17 = scalar_lea.hbm %s5182_s4, 16 }
  0xd8   :  { %p4551_p2 = scmp.ne.s32.totalorder %s5182_s4, %s4550_s17  ;;  %p4554_p3 = scmp.lt.u32.totalorder %s4550_s17, %s5182_s4 }
  0xda   :  { %p4556_p4 = pnand %p4554_p3, %p4551_p2 }
  0xdc   :  { %4559 = shalt.err (!%p4556_p4)
}
  0xdd   :  { %s4560_s28 = scalar_lea.vmem %s308_s24, 16  ;;  %s4564_s6 = scalar_lea.vmem %s308_s24, 32 }
  0xde   :  { %p4561_p5 = scmp.ne.s32.totalorder %s308_s24, %s4560_s28  ;;  %p4565_p6 = scmp.lt.s32.totalorder %s308_s24, %s308_s24 }
  0xdf   :  { %p4566_p7 = scmp.lt.s32.totalorder %s4564_s6, %s4560_s28 }
  0xe1   :  { %p4567_p8 = por %p4566_p7, %p4565_p6 }
  0xe3   :  { %p4568_p9 = pnand %p4567_p8, %p4561_p5 }
  0xe5   :  { %4571 = shalt.err (!%p4568_p9)
}
  0xe6   :  { %310 = dma.hbm_to_vmem [thread:$0]  %s5182_s4, 16, %s308_s24, [#allocation36]  }
  0xe7   :  { %s5024_s3 = smov [#allocation5]   ;;  %s5025_s0 = smov [#allocation10]  }
  0xe8   :  { %s93_s29 = sshll.u32 %s5024_s3, 4  ;;  %s118_s1 = sshll.u32 %s5025_s0, 4  ;;  %s94_s29 = int_to_ptr.vmem [resolvable:$true] %s93_s29  ;;  %s5270_s1 = int_to_ptr.vmem [resolvable:$true] %s118_s1 }
  0xe9   :  { %s4572_s2 = scalar_lea.hbm %s5057_s9, 1024 }
  0xea   :  { %p4573_p10 = scmp.ne.s32.totalorder %s5057_s9, %s4572_s2  ;;  %p4576_p11 = scmp.lt.u32.totalorder %s4572_s2, %s5057_s9 }
  0xec   :  { %p4578_p12 = pnand %p4576_p11, %p4573_p10 }
  0xee   :  { %4581 = shalt.err (!%p4578_p12)
}
  0xef   :  { %s4582_s11 = scalar_lea.vmem %s94_s29, 1024  ;;  %p4587_p0 = scmp.lt.s32.totalorder %s94_s29, %s94_s29 }
  0xf0   :  { %p4583_p13 = scmp.ne.s32.totalorder %s94_s29, %s4582_s11  ;;  %p4588_p1 = scmp.lt.s32.totalorder %s4582_s11, %s4582_s11 }
  0xf2   :  { %p4589_p2 = por %p4588_p1, %p4587_p0 }
  0xf4   :  { %p4590_p3 = pnand %p4589_p2, %p4583_p13 }
  0xf6   :  { %4593 = shalt.err (!%p4590_p3)
}
  0xf7   :  { %96 = dma.hbm_to_vmem [thread:$0]  %s5057_s9, 1024, %s94_s29, [#allocation6]  }
  0xf8   :  { %s4594_s4 = scalar_lea.hbm %s5077_s25, 8000 }
  0xf9   :  { %p4595_p4 = scmp.ne.s32.totalorder %s5077_s25, %s4594_s4  ;;  %p4598_p5 = scmp.lt.u32.totalorder %s4594_s4, %s5077_s25 }
  0xfb   :  { %p4600_p6 = pnand %p4598_p5, %p4595_p4 }
  0xfd   :  { %4603 = shalt.err (!%p4600_p6)
}
  0xfe   :  { %s4604_s15 = scalar_lea.vmem %s5270_s1, 8000  ;;  %p4609_p8 = scmp.lt.s32.totalorder %s5270_s1, %s5270_s1 }
  0xff   :  { %p4605_p7 = scmp.ne.s32.totalorder %s5270_s1, %s4604_s15  ;;  %p4610_p9 = scmp.lt.s32.totalorder %s4604_s15, %s4604_s15 }
 0x101   :  { %p4611_p10 = por %p4610_p9, %p4609_p8 }
 0x103   :  { %p4612_p11 = pnand %p4611_p10, %p4605_p7 }
 0x105   :  { %4615 = shalt.err (!%p4612_p11)
}
 0x106   :  { %124 = dma.hbm_to_vmem [thread:$0]  %s5077_s25, 8000, %s5270_s1, [#allocation9], %s5011_s7, %s5011_s7, %s5012_s10  }
 0x107   :  { %s5026_s9 = smov [#allocation13]   ;;  %s5027_s20 = smov [#allocation16]  }
 0x108   :  { %s143_s16 = sshll.u32 %s5026_s9, 4  ;;  %s165_s14 = sshll.u32 %s5027_s20, 4  ;;  %s144_s16 = int_to_ptr.vmem [resolvable:$true] %s143_s16  ;;  %s166_s14 = int_to_ptr.vmem [resolvable:$true] %s165_s14 }
 0x109   :  { %s4616_s27 = scalar_lea.hbm %s5092_s8, 16 }
 0x10a   :  { %p4617_p12 = scmp.ne.s32.totalorder %s5092_s8, %s4616_s27  ;;  %p4620_p13 = scmp.lt.u32.totalorder %s4616_s27, %s5092_s8 }
 0x10c   :  { %p4622_p0 = pnand %p4620_p13, %p4617_p12 }
 0x10e   :  { %4625 = shalt.err (!%p4622_p0)
}
 0x10f   :  { %s4626_s18 = scalar_lea.vmem %s144_s16, 16  ;;  %s4630_s22 = scalar_lea.vmem %s144_s16, 32 }
 0x110   :  { %p4627_p1 = scmp.ne.s32.totalorder %s144_s16, %s4626_s18  ;;  %p4631_p2 = scmp.lt.s32.totalorder %s144_s16, %s144_s16 }
 0x111   :  { %p4632_p3 = scmp.lt.s32.totalorder %s4630_s22, %s4626_s18 }
 0x113   :  { %p4633_p4 = por %p4632_p3, %p4631_p2 }
 0x115   :  { %p4634_p5 = pnand %p4633_p4, %p4627_p1 }
 0x117   :  { %4637 = shalt.err (!%p4634_p5)
}
 0x118   :  { %146 = dma.hbm_to_vmem [thread:$0]  %s5092_s8, 16, %s144_s16, [#allocation12]  }
 0x119   :  { %s4638_s25 = scalar_lea.hbm %s5102_s19, 16 }
 0x11a   :  { %p4639_p6 = scmp.ne.s32.totalorder %s5102_s19, %s4638_s25  ;;  %p4642_p7 = scmp.lt.u32.totalorder %s4638_s25, %s5102_s19 }
 0x11c   :  { %p4644_p8 = pnand %p4642_p7, %p4639_p6 }
 0x11e   :  { %4647 = shalt.err (!%p4644_p8)
}
 0x11f   :  { %s4648_s24 = scalar_lea.vmem %s166_s14, 16  ;;  %s4652_s23 = scalar_lea.vmem %s166_s14, 32 }
 0x120   :  { %p4649_p9 = scmp.ne.s32.totalorder %s166_s14, %s4648_s24  ;;  %p4653_p10 = scmp.lt.s32.totalorder %s166_s14, %s166_s14 }
 0x121   :  { %p4654_p11 = scmp.lt.s32.totalorder %s4652_s23, %s4648_s24 }
 0x123   :  { %p4655_p12 = por %p4654_p11, %p4653_p10 }
 0x125   :  { %p4656_p13 = pnand %p4655_p12, %p4649_p9 }
 0x127   :  { %4659 = shalt.err (!%p4656_p13)
}
 0x128   :  { %s5585_s26 = sld [smem:[#allocation70_spill]]  ;;  %s5028_s21 = smov [#allocation19]  }
 0x129   :  { %168 = dma.hbm_to_vmem [thread:$0]  %s5102_s19, 16, %s166_s14, [#allocation15]  }
 0x12a   :  { %s184_s8 = sshll.u32 %s5028_s21, 4  ;;  %s5029_s17 = smov [#allocation22]   ;;  %s185_s8 = int_to_ptr.vmem [resolvable:$true] %s184_s8 }
 0x12b   :  { %s207_s28 = sshll.u32 %s5029_s17, 4  ;;  %s208_s28 = int_to_ptr.vmem [resolvable:$true] %s207_s28 }
 0x12e   :  { %s4660_s6 = scalar_lea.hbm %s5585_s26, 1024 }
 0x12f   :  { %p4661_p0 = scmp.ne.s32.totalorder %s5585_s26, %s4660_s6  ;;  %p4664_p1 = scmp.lt.u32.totalorder %s4660_s6, %s5585_s26 }
 0x131   :  { %p4666_p2 = pnand %p4664_p1, %p4661_p0 }
 0x133   :  { %4669 = shalt.err (!%p4666_p2)
}
 0x134   :  { %s4670_s3 = scalar_lea.vmem %s185_s8, 1024  ;;  %p4675_p4 = scmp.lt.s32.totalorder %s185_s8, %s185_s8 }
 0x135   :  { %p4671_p3 = scmp.ne.s32.totalorder %s185_s8, %s4670_s3  ;;  %p4676_p5 = scmp.lt.s32.totalorder %s4670_s3, %s4670_s3 }
 0x137   :  { %p4677_p6 = por %p4676_p5, %p4675_p4 }
 0x139   :  { %p4678_p7 = pnand %p4677_p6, %p4671_p3 }
 0x13b   :  { %4681 = shalt.err (!%p4678_p7)
}
 0x13c   :  { %s5586_s19 = sld [smem:[#allocation71_spill]] }
 0x13d   :  { %190 = dma.hbm_to_vmem [thread:$0]  %s5585_s26, 1024, %s185_s8, [#allocation18], %s5011_s7, %s5011_s7, %s5012_s10  }
 0x142   :  { %s4682_s29 = scalar_lea.hbm %s5586_s19, 16 }
 0x143   :  { %p4683_p8 = scmp.ne.s32.totalorder %s5586_s19, %s4682_s29  ;;  %p4686_p9 = scmp.lt.u32.totalorder %s4682_s29, %s5586_s19 }
 0x145   :  { %p4688_p10 = pnand %p4686_p9, %p4683_p8 }
 0x147   :  { %4691 = shalt.err (!%p4688_p10)
}
 0x148   :  { %s4692_s0 = scalar_lea.vmem %s208_s28, 16  ;;  %s4696_s1 = scalar_lea.vmem %s208_s28, 32 }
 0x149   :  { %p4693_p11 = scmp.ne.s32.totalorder %s208_s28, %s4692_s0  ;;  %p4697_p12 = scmp.lt.s32.totalorder %s208_s28, %s208_s28 }
 0x14a   :  { %p4698_p13 = scmp.lt.s32.totalorder %s4696_s1, %s4692_s0 }
 0x14c   :  { %p4699_p0 = por %p4698_p13, %p4697_p12 }
 0x14e   :  { %p4700_p1 = pnand %p4699_p0, %p4693_p11 }
 0x150   :  { %4703 = shalt.err (!%p4700_p1)
}
 0x151   :  { %s5587_s2 = sld [smem:[#allocation73_spill]]  ;;  %s5030_s11 = smov [#allocation25]  }
 0x152   :  { %210 = dma.hbm_to_vmem [thread:$0]  %s5586_s19, 16, %s208_s28, [#allocation21]  }
 0x153   :  { %s230_s4 = sshll.u32 %s5030_s11, 4  ;;  %s5031_s15 = smov [#allocation28]   ;;  %s231_s4 = int_to_ptr.vmem [resolvable:$true] %s230_s4 }
 0x154   :  { %s253_s9 = sshll.u32 %s5031_s15, 4  ;;  %s254_s9 = int_to_ptr.vmem [resolvable:$true] %s253_s9 }
 0x157   :  { %s4704_s16 = scalar_lea.hbm %s5587_s2, 256 }
 0x158   :  { %p4705_p2 = scmp.ne.s32.totalorder %s5587_s2, %s4704_s16  ;;  %p4708_p3 = scmp.lt.u32.totalorder %s4704_s16, %s5587_s2 }
 0x15a   :  { %p4710_p4 = pnand %p4708_p3, %p4705_p2 }
 0x15c   :  { %4713 = shalt.err (!%p4710_p4)
}
 0x15d   :  { %s4714_s20 = scalar_lea.vmem %s231_s4, 256  ;;  %p4719_p6 = scmp.lt.s32.totalorder %s231_s4, %s231_s4 }
 0x15e   :  { %p4715_p5 = scmp.ne.s32.totalorder %s231_s4, %s4714_s20  ;;  %p4720_p7 = scmp.lt.s32.totalorder %s4714_s20, %s4714_s20 }
 0x160   :  { %p4721_p8 = por %p4720_p7, %p4719_p6 }
 0x162   :  { %p4722_p9 = pnand %p4721_p8, %p4715_p5 }
 0x164   :  { %4725 = shalt.err (!%p4722_p9)
}
 0x165   :  { %s5588_s14 = sld [smem:[#allocation76_spill]] }
 0x166   :  { %236 = dma.hbm_to_vmem [thread:$0]  %s5587_s2, 256, %s231_s4, [#allocation24], %s5011_s7, %s5011_s7, %s5012_s10  }
 0x16b   :  { %s4726_s27 = scalar_lea.hbm %s5588_s14, 16 }
 0x16c   :  { %p4727_p10 = scmp.ne.s32.totalorder %s5588_s14, %s4726_s27  ;;  %p4730_p11 = scmp.lt.u32.totalorder %s4726_s27, %s5588_s14 }
 0x16e   :  { %p4732_p12 = pnand %p4730_p11, %p4727_p10 }
 0x170   :  { %4735 = shalt.err (!%p4732_p12)
}
 0x171   :  { %s4736_s18 = scalar_lea.vmem %s254_s9, 16  ;;  %s4740_s22 = scalar_lea.vmem %s254_s9, 32 }
 0x172   :  { %p4737_p13 = scmp.ne.s32.totalorder %s254_s9, %s4736_s18  ;;  %p4741_p0 = scmp.lt.s32.totalorder %s254_s9, %s254_s9 }
 0x173   :  { %p4742_p1 = scmp.lt.s32.totalorder %s4740_s22, %s4736_s18 }
 0x175   :  { %p4743_p2 = por %p4742_p1, %p4741_p0 }
 0x177   :  { %p4744_p3 = pnand %p4743_p2, %p4737_p13 }
 0x179   :  { %4747 = shalt.err (!%p4744_p3)
}
 0x17a   :  { %s5589_s25 = sld [smem:[#allocation77_spill]]  ;;  %s5032_s24 = smov [#allocation31]  }
 0x17b   :  { %256 = dma.hbm_to_vmem [thread:$0]  %s5588_s14, 16, %s254_s9, [#allocation27]  }
 0x17c   :  { %s275_s23 = sshll.u32 %s5032_s24, 4  ;;  %s5033_s26 = smov [#allocation34]   ;;  %s276_s23 = int_to_ptr.vmem [resolvable:$true] %s275_s23 }
 0x17d   :  { %s294_s21 = sshll.u32 %s5033_s26, 4  ;;  %s5318_s21 = int_to_ptr.vmem [resolvable:$true] %s294_s21 }
 0x180   :  { %s4748_s8 = scalar_lea.hbm %s5589_s25, 16 }
 0x181   :  { %p4749_p4 = scmp.ne.s32.totalorder %s5589_s25, %s4748_s8  ;;  %p4752_p5 = scmp.lt.u32.totalorder %s4748_s8, %s5589_s25 }
 0x183   :  { %p4754_p6 = pnand %p4752_p5, %p4749_p4 }
 0x185   :  { %4757 = shalt.err (!%p4754_p6)
}
 0x186   :  { %s4758_s17 = scalar_lea.vmem %s276_s23, 16  ;;  %s4762_s28 = scalar_lea.vmem %s276_s23, 32 }
 0x187   :  { %p4759_p7 = scmp.ne.s32.totalorder %s276_s23, %s4758_s17  ;;  %p4763_p8 = scmp.lt.s32.totalorder %s276_s23, %s276_s23 }
 0x188   :  { %p4764_p9 = scmp.lt.s32.totalorder %s4762_s28, %s4758_s17 }
 0x18a   :  { %p4765_p10 = por %p4764_p9, %p4763_p8 }
 0x18c   :  { %p4766_p11 = pnand %p4765_p10, %p4759_p7 }
 0x18e   :  { %4769 = shalt.err (!%p4766_p11)
}
 0x18f   :  { %s5590_s6 = sld [smem:[#allocation78_spill]] }
 0x190   :  { %278 = dma.hbm_to_vmem [thread:$0]  %s5589_s25, 16, %s276_s23, [#allocation30]  }
 0x195   :  { %s4770_s3 = scalar_lea.hbm %s5590_s6, 1024 }
 0x196   :  { %p4771_p12 = scmp.ne.s32.totalorder %s5590_s6, %s4770_s3  ;;  %p4774_p13 = scmp.lt.u32.totalorder %s4770_s3, %s5590_s6 }
 0x198   :  { %p4776_p0 = pnand %p4774_p13, %p4771_p12 }
 0x19a   :  { %4779 = shalt.err (!%p4776_p0)
}
 0x19b   :  { %s4780_s19 = scalar_lea.vmem %s5318_s21, 1024  ;;  %p4785_p2 = scmp.lt.s32.totalorder %s5318_s21, %s5318_s21 }
 0x19c   :  { %p4781_p1 = scmp.ne.s32.totalorder %s5318_s21, %s4780_s19  ;;  %p4786_p3 = scmp.lt.s32.totalorder %s4780_s19, %s4780_s19 }
 0x19e   :  { %p4787_p4 = por %p4786_p3, %p4785_p2 }
 0x1a0   :  { %p4788_p5 = pnand %p4787_p4, %p4781_p1 }
 0x1a2   :  { %4791 = shalt.err (!%p4788_p5)
}
 0x1a3   :  { %s5591_s29 = sld [smem:[#allocation79_spill]]  ;;  %s5034_s0 = smov [#allocation37]  }
 0x1a4   :  { %300 = dma.hbm_to_vmem [thread:$0]  %s5590_s6, 1024, %s5318_s21, [#allocation33], %s5011_s7, %s5011_s7, %s5012_s10  }
 0x1a5   :  { %s317_s1 = sshll.u32 %s5034_s0, 4  ;;  %s5035_s2 = smov [#allocation38]   ;;  %s318_s1 = int_to_ptr.vmem [resolvable:$true] %s317_s1 }
 0x1a6   :  { %s329_s11 = sshll.u32 %s5035_s2, 4  ;;  %s330_s11 = int_to_ptr.vmem [resolvable:$true] %s329_s11 }
 0x1a9   :  { %s4792_s4 = scalar_lea.hbm %s5591_s29, 16 }
 0x1aa   :  { %p4793_p6 = scmp.ne.s32.totalorder %s5591_s29, %s4792_s4  ;;  %p4796_p7 = scmp.lt.u32.totalorder %s4792_s4, %s5591_s29 }
 0x1ac   :  { %p4798_p8 = pnand %p4796_p7, %p4793_p6 }
 0x1ae   :  { %4801 = shalt.err (!%p4798_p8)
}
 0x1af   :  { %s4802_s15 = scalar_lea.vmem %s318_s1, 16  ;;  %s4806_s9 = scalar_lea.vmem %s318_s1, 32 }
 0x1b0   :  { %p4803_p9 = scmp.ne.s32.totalorder %s318_s1, %s4802_s15  ;;  %p4807_p10 = scmp.lt.s32.totalorder %s318_s1, %s318_s1 }
 0x1b1   :  { %p4808_p11 = scmp.lt.s32.totalorder %s4806_s9, %s4802_s15 }
 0x1b3   :  { %p4809_p12 = por %p4808_p11, %p4807_p10 }
 0x1b5   :  { %p4810_p13 = pnand %p4809_p12, %p4803_p9 }
 0x1b7   :  { %4813 = shalt.err (!%p4810_p13)
}
 0x1b8   :  { %320 = dma.hbm_to_vmem [thread:$0]  %s5591_s29, 16, %s318_s1, [#allocation36]  }
 0x1b9   :  { %s4814_s7 = scalar_lea.hbm %s5197_s13, 16 }
 0x1ba   :  { %p4815_p0 = scmp.ne.s32.totalorder %s5197_s13, %s4814_s7  ;;  %p4818_p1 = scmp.lt.u32.totalorder %s4814_s7, %s5197_s13 }
 0x1bc   :  { %p4820_p2 = pnand %p4818_p1, %p4815_p0 }
 0x1be   :  { %4823 = shalt.err (!%p4820_p2)
}
 0x1bf   :  { %s4824_s10 = scalar_lea.vmem %s330_s11, 16  ;;  %s4828_s16 = scalar_lea.vmem %s330_s11, 32 }
 0x1c0   :  { %p4825_p3 = scmp.ne.s32.totalorder %s330_s11, %s4824_s10  ;;  %p4829_p4 = scmp.lt.s32.totalorder %s330_s11, %s330_s11 }
 0x1c1   :  { %p4830_p5 = scmp.lt.s32.totalorder %s4828_s16, %s4824_s10 }
 0x1c3   :  { %p4831_p6 = por %p4830_p5, %p4829_p4 }
 0x1c5   :  { %p4832_p7 = pnand %p4831_p6, %p4825_p3 }
 0x1c7   :  { %4835 = shalt.err (!%p4832_p7)
}
 0x1c8   :  { %332 = dma.hbm_to_vmem [thread:$0]  %s5197_s13, 16, %s330_s11, [#allocation39]  }
 0x1c9   :  { %4946 = dma.done.wait [#allocation6], 1024  }
 0x1ca   :  { %4947 = vsyncadd [#allocation6], 4294966272 }
 0x1cb   :  { %4948 = dma.done.wait [#allocation9], 8256  }
 0x1cc   :  { %4949 = vsyncadd [#allocation9], 4294959040 }
 0x1cd   :  { %4950 = dma.done.wait [#allocation12], 32  }
 0x1ce   :  { %4951 = vsyncadd [#allocation12], 4294967264 }
 0x1cf   :  { %4952 = dma.done.wait [#allocation15], 1040  }
 0x1d0   :  { %4953 = vsyncadd [#allocation15], 4294966256 }
 0x1d1   :  { %4954 = dma.done.wait [#allocation18], 1040  }
 0x1d2   :  { %4955 = vsyncadd [#allocation18], 4294966256 }
 0x1d3   :  { %4956 = dma.done.wait [#allocation21], 32  }
 0x1d4   :  { %4957 = vsyncadd [#allocation21], 4294967264 }
 0x1d5   :  { %4958 = dma.done.wait [#allocation24], 2304  }
 0x1d6   :  { %4959 = vsyncadd [#allocation24], 4294964992 }
 0x1d7   :  { %4960 = dma.done.wait [#allocation27], 32  }
 0x1d8   :  { %4961 = vsyncadd [#allocation27], 4294967264 }
 0x1d9   :  { %4962 = dma.done.wait [#allocation30], 1040  }
 0x1da   :  { %4963 = vsyncadd [#allocation30], 4294966256 }
 0x1db   :  { %4964 = dma.done.wait [#allocation33], 1040  }
 0x1dc   :  { %4965 = vsyncadd [#allocation33], 4294966256 }
 0x1dd   :  { %4966 = dma.done.wait [#allocation36], 32  }
 0x1de   :  { %4967 = vsyncadd [#allocation36], 4294967264 }
 0x1df   :  { %4968 = dma.done.wait [#allocation39], 16  }
 0x1e0   :  { %4969 = vsyncadd [#allocation39], 4294967280  ;;  %v4100_v0 = vld [vmem:[#allocation10 + $0x40] sm:$0xff]   ;;  %v4104_v4 = vld [vmem:[#allocation10 + $0x48] sm:$0xff]   ;;  %v5036_v41 = vmov 0   ;;  %s5592_s13 = sld [smem:[#allocation69_spill]] }
 0x1e1   :  { %v4101_v1 = vld [vmem:[#allocation10 + $0xc0] sm:$0xff]   ;;  %3649 = vmatprep.subr.bf16.mxu0 %v4100_v0  ;;  %v4105_v5 = vld [vmem:[#allocation10 + $0xc8] sm:$0xff]   ;;  %v4108_v8 = vld [vmem:[#allocation10 + $0x50] sm:$0xff]   ;;  %s5593_s20 = sld [smem:[#allocation67_spill]]  ;;  %vm948_vm0 = vcmask 850944   ;;  %vm952_vm1 = vcmask 1043456  }
 0x1e2   :  { %v4102_v2 = vld [vmem:[#allocation10] sm:$0xff]   ;;  %3671 = vmatprep.subr.bf16.mxu1 %v4101_v1  ;;  %v4106_v6 = vld [vmem:[#allocation10 + $0x8] sm:$0xff]   ;;  %v4109_v9 = vld [vmem:[#allocation10 + $0xd0] sm:$0xff]   ;;  %s5594_s14 = sld [smem:[#allocation66_spill]]  ;;  %vm5038_vm2 = vmmov 0   ;;  %vm1319_vm3 = vcmask 1040384  }
 0x1e3   :  { %v4103_v3 = vld [vmem:[#allocation10 + $0x80] sm:$0xff]   ;;  %3650 = vmatpush3.bf16.msra.mxu0 %v4102_v2  ;;  %v4107_v7 = vld [vmem:[#allocation10 + $0x88] sm:$0xff]   ;;  %v4110_v10 = vld [vmem:[#allocation10 + $0x10] sm:$0xff]   ;;  %vm1128_vm4 = vcmask 261120   ;;  %vm1315_vm5 = vcmask 138240   ;;  %s5595_s27 = sld [smem:[#allocation74_spill]] }
 0x1e4   :  { %3672 = vmatpush3.bf16.msra.mxu1 %v4103_v3  ;;  %3651 = vmatprep.subr.bf16.mxu0 %v4104_v4  ;;  %v4111_v11 = vld [vmem:[#allocation10 + $0x90] sm:$0xff]   ;;  %v4112_v12 = vld [vmem:[#allocation10 + $0x58] sm:$0xff]   ;;  %v4116_v16 = vld [vmem:[#allocation10 + $0x60] sm:$0xff]   ;;  %s5039_s18 = smov [#allocation2]   ;;  %s5040_s25 = smov [#allocation3]  }
 0x1e5   :  { %3673 = vmatprep.subr.bf16.mxu1 %v4105_v5  ;;  %v4113_v13 = vld [vmem:[#allocation10 + $0xd8] sm:$0xff]   ;;  %v4117_v17 = vld [vmem:[#allocation10 + $0xe0] sm:$0xff]   ;;  %v4120_v20 = vld [vmem:[#allocation10 + $0x68] sm:$0xff]   ;;  %s407_s22 = sshll.u32 %s5039_s18, 4  ;;  %s419_s24 = sshll.u32 %s5040_s25, 4  ;;  %s408_s22 = int_to_ptr.vmem [resolvable:$true] %s407_s22  ;;  %s420_s24 = int_to_ptr.vmem [resolvable:$true] %s419_s24 }
 0x1e6   :  { %v4114_v14 = vld [vmem:[#allocation10 + $0x18] sm:$0xff]   ;;  %v4118_v18 = vld [vmem:[#allocation10 + $0x20] sm:$0xff]   ;;  %v4121_v21 = vld [vmem:[#allocation10 + $0xe8] sm:$0xff]  }
 0x1e7   :  { %3652 = vmatpush3.bf16.msra.mxu0 %v4106_v6  ;;  %v4115_v15 = vld [vmem:[#allocation10 + $0x98] sm:$0xff]   ;;  %v4119_v19 = vld [vmem:[#allocation10 + $0xa0] sm:$0xff]   ;;  %v4122_v22 = vld [vmem:[#allocation10 + $0x28] sm:$0xff]  }
 0x1e8   :  { %3674 = vmatpush3.bf16.msra.mxu1 %v4107_v7  ;;  %3653 = vmatprep.subr.bf16.mxu0 %v4108_v8  ;;  %v4123_v23 = vld [vmem:[#allocation10 + $0xa8] sm:$0xff]   ;;  %v4124_v24 = vld [vmem:[#allocation10 + $0x70] sm:$0xff]   ;;  %v4128_v28 = vld [vmem:[#allocation10 + $0x78] sm:$0xff]  }
 0x1e9   :  { %3675 = vmatprep.subr.bf16.mxu1 %v4109_v9  ;;  %v4125_v25 = vld [vmem:[#allocation10 + $0xf0] sm:$0xff]   ;;  %v4129_v29 = vld [vmem:[#allocation10 + $0xf8] sm:$0xff]   ;;  %v426_v33 = vld [vmem:[#allocation5 + $0x18] sm:$0xff]  ;;  %s4836_s23 = scalar_lea.hbm %s5595_s27, 8000 }
 0x1ea   :  { %v4126_v26 = vld [vmem:[#allocation10 + $0x30] sm:$0xff]   ;;  %v4130_v30 = vld [vmem:[#allocation10 + $0x38] sm:$0xff]   ;;  %v5346_v36 = vpack.c.bf16 %v426_v33, %v426_v33  ;;  %v425_v38 = vld [vmem:[#allocation5 + $0x10] sm:$0xff]  ;;  %p4837_p8 = scmp.ne.s32.totalorder %s5595_s27, %s4836_s23  ;;  %p4840_p9 = scmp.lt.u32.totalorder %s4836_s23, %s5595_s27 }
 0x1eb   :  { %3654 = vmatpush3.bf16.msra.mxu0 %v4110_v10  ;;  %v4127_v27 = vld [vmem:[#allocation10 + $0xb0] sm:$0xff]   ;;  %v4131_v31 = vld [vmem:[#allocation10 + $0xb8] sm:$0xff]   ;;  %v5350_v39 = vpack.c.bf16 %v425_v38, %v425_v38  ;;  %v4132_v40 = vld [vmem:[#allocation10 + $0x140] sm:$0xff]  }
 0x1ec   :  { %3676 = vmatpush3.bf16.msra.mxu1 %v4111_v11  ;;  %3655 = vmatprep.subr.bf16.mxu0 %v4112_v12  ;;  %v424_v32 = vld [vmem:[#allocation5 + $0x8] sm:$0xff]  ;;  %v423_v34 = vld [vmem:[#allocation5] sm:$0xff]  ;;  %v4133_v42 = vld [vmem:[#allocation10 + $0x100] sm:$0xff]   ;;  %p4842_p10 = pnand %p4840_p9, %p4837_p8 }
 0x1ed   :  { %3677 = vmatprep.subr.bf16.mxu1 %v4113_v13  ;;  %v5344_v35 = vpack.c.bf16 %v424_v32, %v424_v32  ;;  %v5348_v37 = vpack.c.bf16 %v423_v34, %v423_v34  ;;  %1028 = vmatprep.mubr.bf16.mxu1 %v5346_v36  ;;  %v4134_v43 = vld [vmem:[#allocation10 + $0x180] sm:$0xff]   ;;  %v4135_v44 = vld [vmem:[#allocation10 + $0x148] sm:$0xff]   ;;  %v4138_v47 = vld [vmem:[#allocation10 + $0x150] sm:$0xff]  }
 0x1ee   :  { %v4136_v45 = vld [vmem:[#allocation10 + $0x108] sm:$0xff]   ;;  %v4139_v48 = vld [vmem:[#allocation10 + $0x110] sm:$0xff]   ;;  %v4141_v50 = vld [vmem:[#allocation10 + $0x158] sm:$0xff]  }
 0x1ef   :  { %3656 = vmatpush3.bf16.msra.mxu0 %v4114_v14  ;;  %988 = vmatprep.mubr.bf16.mxu0 %v5344_v35  ;;  %v4137_v46 = vld [vmem:[#allocation10 + $0x188] sm:$0xff]   ;;  %v4140_v49 = vld [vmem:[#allocation10 + $0x190] sm:$0xff]   ;;  %v4142_v51 = vld [vmem:[#allocation10 + $0x118] sm:$0xff]  }
 0x1f0   :  { %3678 = vmatpush3.bf16.msra.mxu1 %v4115_v15  ;;  %3657 = vmatprep.subr.bf16.mxu0 %v4116_v16  ;;  %v4143_v52 = vld [vmem:[#allocation10 + $0x198] sm:$0xff]   ;;  %v4144_v53 = vld [vmem:[#allocation10 + $0x160] sm:$0xff]   ;;  %v4147_v56 = vld [vmem:[#allocation10 + $0x168] sm:$0xff]  }
 0x1f1   :  { %3679 = vmatprep.subr.bf16.mxu1 %v4117_v17  ;;  %v4145_v54 = vld [vmem:[#allocation10 + $0x120] sm:$0xff]   ;;  %v4148_v57 = vld [vmem:[#allocation10 + $0x128] sm:$0xff]   ;;  %v4150_v59 = vld [vmem:[#allocation10 + $0x170] sm:$0xff]  }
 0x1f2   :  { %v4146_v55 = vld [vmem:[#allocation10 + $0x1a0] sm:$0xff]   ;;  %v4149_v58 = vld [vmem:[#allocation10 + $0x1a8] sm:$0xff]   ;;  %v4151_v60 = vld [vmem:[#allocation10 + $0x130] sm:$0xff]  }
 0x1f3   :  { %3658 = vmatpush3.bf16.msra.mxu0 %v4118_v18  ;;  %v428_v61 = vld [vmem:[#allocation5 + $0x28] sm:$0xff]  ;;  %v4152_v62 = vld [vmem:[#allocation10 + $0x1b0] sm:$0xff]   ;;  %v4157_v6 = vld [vmem:[#allocation10 + $0x1c0] sm:$0xff]  }
 0x1f4   :  { %3680 = vmatpush3.bf16.msra.mxu1 %v4119_v19  ;;  %3659 = vmatprep.subr.bf16.mxu0 %v4120_v20  ;;  %v5362_v63 = vpack.c.bf16 %v428_v61, %v428_v61  ;;  %v4153_v0 = vld [vmem:[#allocation10 + $0x178] sm:$0xff]   ;;  %v427_v3 = vld [vmem:[#allocation5 + $0x20] sm:$0xff]  ;;  %v4160_v9 = vld [vmem:[#allocation10 + $0x1c8] sm:$0xff]  }
 0x1f5   :  { %3681 = vmatprep.subr.bf16.mxu1 %v4121_v21  ;;  %v4154_v1 = vld [vmem:[#allocation10 + $0x138] sm:$0xff]   ;;  %v4156_v4 = vld [vmem:[%s5592_s13 + $0x40] sm:$0xff]   ;;  %v5368_v5 = vpack.c.bf16 %v427_v3, %v427_v3  ;;  %v4162_v11 = vld [vmem:[%s5592_s13 + $0x50] sm:$0xff]  }
 0x1f6   :  { %v4155_v2 = vld [vmem:[#allocation10 + $0x1b8] sm:$0xff]   ;;  %v4158_v7 = vld [vmem:[%s5592_s13] sm:$0xff]   ;;  %v4164_v13 = vld [vmem:[%s5592_s13 + $0x10] sm:$0xff]  }
 0x1f7   :  { %3660 = vmatpush3.bf16.msra.mxu0 %v4122_v22  ;;  %v4159_v8 = vld [vmem:[%s5592_s13 + $0x48] sm:$0xff]   ;;  %v4163_v12 = vld [vmem:[#allocation10 + $0x1d0] sm:$0xff]   ;;  %v4165_v14 = vld [vmem:[%s5592_s13 + $0x58] sm:$0xff]  }
 0x1f8   :  { %3682 = vmatpush3.bf16.msra.mxu1 %v4123_v23  ;;  %3661 = vmatprep.subr.bf16.mxu0 %v4124_v24  ;;  %v4161_v10 = vld [vmem:[%s5592_s13 + $0x8] sm:$0xff]   ;;  %v4167_v16 = vld [vmem:[%s5592_s13 + $0x18] sm:$0xff]   ;;  %v4168_v18 = vld [vmem:[%s5592_s13 + $0x60] sm:$0xff]  }
 0x1f9   :  { %3683 = vmatprep.subr.bf16.mxu1 %v4125_v25  ;;  %v4166_v15 = vld [vmem:[#allocation10 + $0x1d8] sm:$0xff]   ;;  %v430_v17 = vld [vmem:[#allocation5 + $0x38] sm:$0xff]  ;;  %v4169_v20 = vld [vmem:[#allocation10 + $0x1e0] sm:$0xff]  }
 0x1fa   :  { %v5383_v19 = vpack.c.bf16 %v430_v17, %v430_v17  ;;  %v4170_v21 = vld [vmem:[%s5592_s13 + $0x20] sm:$0xff]   ;;  %v432_v23 = vld [vmem:[%s5593_s20 + $0x8] sm:$0xff]  ;;  %v4177_v32 = vld [vmem:[%s5592_s13 + $0x78] sm:$0xff]  }
 0x1fb   :  { %3662 = vmatpush3.bf16.msra.mxu0 %v4126_v26  ;;  %v4175_v22 = vld [vmem:[#allocation10 + $0x1f0] ss:$0 sps:$4 sm:$0xff]   ;;  %v4171_v24 = vld [vmem:[%s5592_s13 + $0x68] sm:$0xff]   ;;  %v5391_v25 = vpack.c.bf16 %v432_v23, %v432_v23  ;;  %v4172_v26 = vld [vmem:[#allocation10 + $0x1e8] sm:$0xff]  }
 0x1fc   :  { %3684 = vmatpush3.bf16.msra.mxu1 %v4127_v27  ;;  %3663 = vmatprep.subr.bf16.mxu0 %v4128_v28  ;;  %v4173_v27 = vld [vmem:[%s5592_s13 + $0x28] sm:$0xff]   ;;  %v4174_v28 = vld [vmem:[%s5592_s13 + $0x70] sm:$0xff]   ;;  %v4178_v33 = vld [vmem:[#allocation8] sm:$0xff]  }
 0x1fd   :  { %3685 = vmatprep.subr.bf16.mxu1 %v4129_v29  ;;  %v954_v29 = vsel %vm952_vm1, %v4175_v22, 0  ;;  %v4179_v34 = vld [vmem:[%s5592_s13 + $0x38] sm:$0xff]   ;;  %v431_v38 = vld [vmem:[%s5593_s20] sm:$0xff] }
 0x1ff   :  { %3664 = vmatpush3.bf16.msra.mxu0 %v4130_v30  ;;  %v4176_v30 = vld [vmem:[%s5592_s13 + $0x30] sm:$0xff]  }
 0x200   :  { %3686 = vmatpush3.bf16.msra.mxu1 %v4131_v31  ;;  %3693 = vmatprep.subr.bf16.mxu0 %v4132_v40  ;;  %v429_v31 = vld [vmem:[#allocation5 + $0x30] sm:$0xff] }
 0x201   :  { %1076 = vmatprep.subr.bf16.mxu1 %v5036_v41  ;;  %v5403_v40 = vpack.c.bf16 %v429_v31, %v429_v31 }
 0x202   :  { %989 = vmatmul.mubr.bf16.vlgmr.msra.gmra.mrb[0].mxu0 %v5348_v37 }
 0x203   :  { %1029 = vmatmul.mubr.bf16.vlgmr.msra.gmra.mrb[0].mxu1 %v5350_v39  ;;  %3694 = vmatpush3.bf16.msra.mxu0 %v4133_v42  ;;  %v5037_v42 = vmov 0.0  }
 0x204   :  { %1077 = vmatpush1.bf16.msra.mxu1 %v4134_v43  ;;  %3695 = vmatprep.subr.bf16.mxu0 %v4135_v44  ;;  %v4180_v43 = vld [vmem:[#allocation8 + $0x8] sm:$0xff]   ;;  %v5407_v44 = vpack.c.bf16 %v431_v38, %v431_v38 }
 0x205   :  { %1078 = vmatprep.subr.bf16.mxu1 %v5036_v41  ;;  %1068 = vmatprep.mubr.bf16.mxu0 %v5362_v63 }
 0x206   :  { %3468 = vmatprep.mubr.msk.bf16.mxu1 %vm948_vm0, %v5383_v19 }
 0x207   :  { %3696 = vmatpush3.bf16.msra.mxu0 %v4136_v45  ;;  %v434_v45 = vld [vmem:[%s5594_s14] sm:$0xff] }
 0x208   :  { %1079 = vmatpush1.bf16.msra.mxu1 %v4137_v46  ;;  %3697 = vmatprep.subr.bf16.mxu0 %v4138_v47  ;;  %v435_v46 = vpack.c.bf16 %v434_v45, %v434_v45  ;;  %v4181_v47 = vld [vmem:[%s5592_s13 + $0x80] sm:$0xff]  }
 0x209   :  { %1080 = vmatprep.subr.bf16.mxu1 %v5036_v41 }
 0x20b   :  { %3698 = vmatpush3.bf16.msra.mxu0 %v4139_v48  ;;  %v4182_v48 = vld [vmem:[%s5592_s13 + $0x88] ss:$0 sps:$4 sm:$0x11]  }
 0x20c   :  { %1081 = vmatpush1.bf16.msra.mxu1 %v4140_v49  ;;  %3699 = vmatprep.subr.bf16.mxu0 %v4141_v50  ;;  %v5421_v49 = vsel %vm1319_vm3, 65535, %v5036_v41 }
 0x20d   :  { %1082 = vmatprep.subr.bf16.mxu1 %v5036_v41  ;;  %v1323_v50 = vand.u32 %v4182_v48, %v5421_v49 }
 0x20f   :  { %3700 = vmatpush3.bf16.msra.mxu0 %v4142_v51  ;;  %v433_v51 = vld [vmem:[%s5593_s20 + $0x10] sm:$0xff] }
 0x210   :  { %1083 = vmatpush1.bf16.msra.mxu1 %v4143_v52  ;;  %3701 = vmatprep.subr.bf16.mxu0 %v4144_v53  ;;  %v5430_v52 = vpack.c.bf16 %v433_v51, %v433_v51  ;;  %v4183_v53 = vld [vmem:[#allocation14] sm:$0xff]  }
 0x211   :  { %1084 = vmatprep.subr.bf16.mxu1 %v5036_v41 }
 0x213   :  { %3702 = vmatpush3.bf16.msra.mxu0 %v4145_v54  ;;  %v4184_v54 = vld [vmem:[#allocation14 + $0x8] sm:$0xff]  }
 0x214   :  { %1085 = vmatpush1.bf16.msra.mxu1 %v4146_v55  ;;  %3703 = vmatprep.subr.bf16.mxu0 %v4147_v56  ;;  %v4185_v55 = vld [vmem:[#allocation14 + $0x10] sm:$0xff]   ;;  %v4186_v56 = vld [vmem:[#allocation14 + $0x18] sm:$0xff]  }
 0x215   :  { %1086 = vmatprep.subr.bf16.mxu1 %v5036_v41 }
 0x217   :  { %3704 = vmatpush3.bf16.msra.mxu0 %v4148_v57  ;;  %v4187_v57 = vld [vmem:[#allocation14 + $0x20] sm:$0xff]  }
 0x218   :  { %1087 = vmatpush1.bf16.msra.mxu1 %v4149_v58  ;;  %3705 = vmatprep.subr.bf16.mxu0 %v4150_v59  ;;  %v4188_v58 = vld [vmem:[#allocation14 + $0x28] sm:$0xff]   ;;  %v4189_v59 = vld [vmem:[#allocation14 + $0x30] sm:$0xff]  }
 0x219   :  { %1088 = vmatprep.subr.bf16.mxu1 %v5036_v41 }
 0x21b   :  { %3706 = vmatpush3.bf16.msra.mxu0 %v4151_v60  ;;  %v4190_v60 = vld [vmem:[#allocation14 + $0x38] sm:$0xff]  }
 0x21c   :  { %1089 = vmatpush1.bf16.msra.mxu1 %v4152_v62  ;;  %3707 = vmatprep.subr.bf16.mxu0 %v4153_v0 }
 0x21d   :  { %1090 = vmatprep.subr.bf16.mxu1 %v5036_v41 }
 0x21f   :  { %3708 = vmatpush3.bf16.msra.mxu0 %v4154_v1 }
 0x220   :  { %1091 = vmatpush1.bf16.msra.mxu1 %v4155_v2  ;;  %3718 = vmatprep.subr.bf16.mxu0 %v4156_v4 }
 0x221   :  { %1092 = vmatprep.subr.bf16.mxu1 %v5036_v41 }
 0x222   :  { %1069 = vmatmul.mubr.bf16.vlgmr.msra.gmra.mrb[4].mxu0 %v5368_v5 }
 0x223   :  { %3719 = vmatpush3.bf16.msra.mxu0 %v4158_v7  ;;  %1357 = vmatprep.mubr.bf16.mxu0 %v5391_v25 }
 0x224   :  { %1093 = vmatpush1.bf16.msra.mxu1 %v4157_v6  ;;  %3720 = vmatprep.subr.bf16.mxu0 %v4159_v8 }
 0x225   :  { %1094 = vmatprep.subr.bf16.mxu1 %v5036_v41 }
 0x227   :  { %3721 = vmatpush3.bf16.msra.mxu0 %v4161_v10 }
 0x228   :  { %1095 = vmatpush1.bf16.msra.mxu1 %v4160_v9  ;;  %3722 = vmatprep.subr.bf16.mxu0 %v4162_v11 }
 0x229   :  { %1096 = vmatprep.subr.bf16.mxu1 %v5036_v41 }
 0x22b   :  { %3723 = vmatpush3.bf16.msra.mxu0 %v4164_v13 }
 0x22c   :  { %1097 = vmatpush1.bf16.msra.mxu1 %v4163_v12  ;;  %3724 = vmatprep.subr.bf16.mxu0 %v4165_v14 }
 0x22d   :  { %1098 = vmatprep.subr.bf16.mxu1 %v5036_v41 }
 0x22f   :  { %3725 = vmatpush3.bf16.msra.mxu0 %v4167_v16 }
 0x230   :  { %1099 = vmatpush1.bf16.msra.mxu1 %v4166_v15  ;;  %3726 = vmatprep.subr.bf16.mxu0 %v4168_v18 }
 0x231   :  { %1100 = vmatprep.subr.bf16.mxu1 %v5036_v41 }
 0x233   :  { %3727 = vmatpush3.bf16.msra.mxu0 %v4170_v21 }
 0x234   :  { %1101 = vmatpush1.bf16.msra.mxu1 %v4169_v20  ;;  %3728 = vmatprep.subr.bf16.mxu0 %v4171_v24 }
 0x235   :  { %1102 = vmatprep.subr.bf16.mxu1 %v5036_v41 }
 0x237   :  { %3729 = vmatpush3.bf16.msra.mxu0 %v4173_v27 }
 0x238   :  { %1103 = vmatpush1.bf16.msra.mxu1 %v4172_v26  ;;  %3730 = vmatprep.subr.bf16.mxu0 %v4174_v28 }
 0x239   :  { %1104 = vmatprep.subr.bf16.mxu1 %v5036_v41 }
 0x23b   :  { %3731 = vmatpush3.bf16.msra.mxu0 %v4176_v30 }
 0x23c   :  { %1105 = vmatpush1.bf16.msra.mxu1 %v954_v29  ;;  %3732 = vmatprep.subr.bf16.mxu0 %v4177_v32 }
 0x23d   :  { %3882 = vmatprep.subr.bf16.mxu1 %v5037_v42 }
 0x23f   :  { %1109 = vmatmul.mubr.bf16.vlgmr.msra.gmra.mrb[4].mxu1 %v5403_v40  ;;  %3733 = vmatpush3.bf16.msra.mxu0 %v4179_v34 }
 0x240   :  { %3883 = vmatpush3.bf16.msra.mxu1 %v4178_v33  ;;  %3886 = vmatprep.mubr.msk.bf16.mxu1 %vm5038_vm2, %v5037_v42 }
 0x241   :  { %3884 = vmatprep.subr.bf16.mxu1 %v5037_v42  ;;  %3898 = vmatprep.subr.bf16.mxu0 %v5037_v42 }
 0x242   :  { %1358 = vmatmul.mubr.bf16.vlgmr.msra.gmra.mrb[8].mxu0 %v5407_v44 }
 0x243   :  { %3914 = vmatprep.mubr.msk.bf16.mxu0 %vm5038_vm2, %v5037_v42  ;;  %3899 = vmatpush3.bf16.msra.mxu0 %v4183_v53 }
 0x244   :  { %3885 = vmatpush3.bf16.msra.mxu1 %v4180_v43  ;;  %3900 = vmatprep.subr.bf16.mxu0 %v5037_v42 }
 0x245   :  { %3890 = vmatprep.subr.bf16.mxu1 %v5037_v42 }
 0x247   :  { %3901 = vmatpush3.bf16.msra.mxu0 %v4184_v54 }
 0x248   :  { %3902 = vmatprep.subr.bf16.mxu0 %v5037_v42 }
 0x24b   :  { %3887 = vmatmul.mubr.msk.bf16.vlgmr.msra.gmra.mrb[4].mxu1 %vm1128_vm4, %v435_v46  ;;  %3903 = vmatpush3.bf16.msra.mxu0 %v4185_v55 }
 0x24c   :  { %3891 = vmatpush3.bf16.msra.mxu1 %v4181_v47  ;;  %3894 = vmatprep.mubr.msk.bf16.mxu1 %vm5038_vm2, %v5037_v42 }
 0x24d   :  { %3892 = vmatprep.subr.bf16.mxu1 %v5037_v42  ;;  %3904 = vmatprep.subr.bf16.mxu0 %v5037_v42 }
 0x24f   :  { %3905 = vmatpush3.bf16.msra.mxu0 %v4186_v56 }
 0x250   :  { %3893 = vmatpush3.bf16.msra.mxu1 %v1323_v50  ;;  %3906 = vmatprep.subr.bf16.mxu0 %v5037_v42 }
 0x251   :  { %3918 = vmatprep.subr.bf16.mxu1 %v5037_v42 }
 0x253   :  { %3907 = vmatpush3.bf16.msra.mxu0 %v4187_v57 }
 0x254   :  { %3908 = vmatprep.subr.bf16.mxu0 %v5037_v42 }
 0x257   :  { %3895 = vmatmul.mubr.msk.bf16.vlgmr.msra.gmra.mrb[4].mxu1 %vm1315_vm5, %v5430_v52  ;;  %3909 = vmatpush3.bf16.msra.mxu0 %v4188_v58 }
 0x258   :  { %3934 = vmatprep.mubr.msk.bf16.mxu1 %vm5038_vm2, %v5037_v42  ;;  %3910 = vmatprep.subr.bf16.mxu0 %v5037_v42 }
 0x25b   :  { %3911 = vmatpush3.bf16.msra.mxu0 %v4189_v59 }
 0x25c   :  { %3912 = vmatprep.subr.bf16.mxu0 %v5037_v42 }
 0x25f   :  { %3913 = vmatpush3.bf16.msra.mxu0 %v4190_v60  ;;  %v3491_v60 = vld [vmem:[#allocation11] ss:$0 sm:$0xff] }
 0x2d5   :  { %v3665_v61 = vpop.f32.mrb[0].mxu0 }
 0x2d6   :  { %v3687_v62 = vpop.f32.mrb[0].mxu1  ;;  %v3666_v0 = vpop.f32.mrb[1].mxu0 }
 0x2d7   :  { %v3688_v1 = vpop.f32.mrb[1].mxu1  ;;  %v3667_v2 = vadd.f32 %v3666_v0, %v3665_v61  ;;  %v3668_v6 = vpop.f32.mrb[2].mxu0 }
 0x2d8   :  { %v3689_v3 = vadd.f32 %v3688_v1, %v3687_v62  ;;  %v3690_v4 = vpop.f32.mrb[2].mxu1  ;;  %v3669_v8 = vpop.f32.mrb[3].mxu0  ;;  %v3492_v62 = vld [vmem:[#allocation13] ss:$0 sm:$0xff]  ;;  %v4192_v6 = vld [vmem:[#allocation19 + $0x8] sm:$0xff]  }
 0x2d9   :  { %v3691_v7 = vpop.f32.mrb[3].mxu1  ;;  %v4191_v4 = vld [vmem:[#allocation19] sm:$0xff]   ;;  %v4194_v8 = vld [vmem:[#allocation19 + $0x18] sm:$0xff]  }
 0x2da   :  { %v1031_v9 = vadd.f32 %v3689_v3, %v3667_v2  ;;  %3919 = vmatpush3.bf16.msra.mxu1 %v4191_v4  ;;  %v4193_v7 = vld [vmem:[#allocation19 + $0x10] sm:$0xff]   ;;  %v4216_v4 = vld [vmem:[#allocation23 + $0x54] ss:$8 sps:$4 sm:$0xff]  }
 0x2db   :  { %3920 = vmatprep.subr.bf16.mxu1 %v5037_v42 }
 0x2de   :  { %3921 = vmatpush3.bf16.msra.mxu1 %v4192_v6  ;;  %v4214_v6 = vld [vmem:[#allocation23 + $0x50] ss:$8 sps:$4 sm:$0xff]  }
 0x2df   :  { %3922 = vmatprep.subr.bf16.mxu1 %v5037_v42 }
 0x2e2   :  { %3923 = vmatpush3.bf16.msra.mxu1 %v4193_v7  ;;  %v4219_v7 = vld [vmem:[#allocation23 + $0x64] ss:$8 sps:$4 sm:$0xff]  }
 0x2e3   :  { %3924 = vmatprep.subr.bf16.mxu1 %v5037_v42 }
 0x2e6   :  { %3925 = vmatpush3.bf16.msra.mxu1 %v4194_v8  ;;  %v4217_v8 = vld [vmem:[#allocation23 + $0x60] ss:$8 sps:$4 sm:$0xff]  }
 0x2e7   :  { %3926 = vmatprep.subr.bf16.mxu1 %v5037_v42 }
 0x2f5   :  { %v3709_v10 = vpop.f32.mrb[4].mxu0 }
 0x2f6   :  { %v3710_v11 = vpop.f32.mrb[5].mxu0 }
 0x2f7   :  { %v3711_v12 = vadd.f32 %v3710_v11, %v3709_v10  ;;  %v3712_v13 = vpop.f32.mrb[6].mxu0  ;;  %v4196_v10 = vld [vmem:[#allocation19 + $0x28] sm:$0xff]   ;;  %v4197_v11 = vld [vmem:[#allocation19 + $0x30] sm:$0xff]  }
 0x2f8   :  { %v3713_v14 = vpop.f32.mrb[7].mxu0 }
 0x2f9   :  { %v1071_v15 = vadd.f32 %v3711_v12, %v1031_v9  ;;  %v4195_v9 = vld [vmem:[#allocation19 + $0x20] sm:$0xff]   ;;  %v4198_v12 = vld [vmem:[#allocation19 + $0x38] sm:$0xff]  }
 0x2fa   :  { %3927 = vmatpush3.bf16.msra.mxu1 %v4195_v9  ;;  %v4222_v9 = vld [vmem:[#allocation23 + $0x74] ss:$8 sps:$4 sm:$0xff]  }
 0x2fb   :  { %3928 = vmatprep.subr.bf16.mxu1 %v5037_v42 }
 0x2fe   :  { %3929 = vmatpush3.bf16.msra.mxu1 %v4196_v10  ;;  %v4220_v10 = vld [vmem:[#allocation23 + $0x70] ss:$8 sps:$4 sm:$0xff]  }
 0x2ff   :  { %3930 = vmatprep.subr.bf16.mxu1 %v5037_v42 }
 0x302   :  { %3931 = vmatpush3.bf16.msra.mxu1 %v4197_v11 }
 0x303   :  { %3932 = vmatprep.subr.bf16.mxu1 %v5037_v42 }
 0x306   :  { %3933 = vmatpush3.bf16.msra.mxu1 %v4198_v12 }
 0x315   :  { %v3734_v16 = vpop.f32.mrb[8].mxu0 }
 0x316   :  { %v3735_v17 = vpop.f32.mrb[9].mxu0 }
 0x317   :  { %v3736_v18 = vadd.f32 %v3735_v17, %v3734_v16  ;;  %v3737_v20 = vpop.f32.mrb[10].mxu0 }
 0x318   :  { %v3738_v21 = vpop.f32.mrb[11].mxu0 }
 0x319   :  { %v4014_v22 = vadd.f32 %v3736_v18, %v1071_v15 }
 0x32a   :  { %v1399_v23 = vpop.f32.mrb[4].mxu1 }
 0x32b   :  { %v4015_v24 = vadd.f32 %v4014_v22, %v1399_v23  ;;  %v3896_v26 = vpop.f32.mrb[5].mxu1 }
 0x32c   :  { %v1402_v27 = vpop.f32.mrb[6].mxu1 }
 0x32d   :  { %v1406_v28 = vrot.slane %v4015_v24, 4  ;;  %v1414_v29 = vmul.f32 %v4015_v24, %v4015_v24  ;;  %v3897_v30 = vpop.f32.mrb[7].mxu1 }
 0x32f   :  { %v1407_v31 = vadd.f32 %v4015_v24, %v1406_v28  ;;  %v1415_v32 = vrot.slane %v1414_v29, 4 }
 0x331   :  { %v1408_v33 = vrot.slane %v1407_v31, 2  ;;  %v1416_v34 = vadd.f32 %v1415_v32, %v1414_v29 }
 0x333   :  { %v1409_v38 = vadd.f32 %v1408_v33, %v1407_v31  ;;  %v1417_v43 = vrot.slane %v1416_v34, 2 }
 0x335   :  { %v1410_v45 = vrot.slane %v1409_v38, 1  ;;  %v1418_v46 = vadd.f32 %v1417_v43, %v1416_v34 }
 0x337   :  { %v1411_v47 = vadd.f32 %v1410_v45, %v1409_v38  ;;  %v1419_v48 = vrot.slane %v1418_v46, 1 }
 0x339   :  { %v1413_v50 = vmul.f32 0.125, %v1411_v47  ;;  %v1420_v51 = vadd.f32 %v1419_v48, %v1418_v46  ;;  %v3501_v48 = vld [vmem:[#allocation16] ss:$0 sm:$0xff] }
 0x33b   :  { %v1421_v53 = vmul.f32 0.125, %v1420_v51  ;;  %v1422_v54 = vmul.f32 %v1413_v50, %v1413_v50  ;;  %v1425_v58 = vsub.f32 %v4015_v24, %v1413_v50  ;;  %v3502_v51 = vld [vmem:[#allocation17] ss:$0 sm:$0xff] }
 0x33d   :  { %v1423_v55 = vsub.f32 %v1421_v53, %v1422_v54 }
 0x33f   :  { %v1424_v56 = vmax.f32 %v1423_v55, 0.0 }
 0x341   :  { %v1426_v57 = vadd.f32 1e-05, %v1424_v56 }
 0x343   :  { %4223 = vrsqrt.f32 %v1426_v57  ;;  %v4201_v57 = vld [vmem:[#allocation23 + $0x4] ss:$8 sps:$4 sm:$0xff]  }
 0x344   :  { %1843 = vmatprep.subr.bf16.mxu0 %v4201_v57 }
 0x34d   :  { %v4224_v59 = vpop.eup %4223 }
 0x34e   :  { %v1428_v61 = vmul.f32 %v4224_v59, %v1425_v58  ;;  %v4199_v58 = vld [vmem:[#allocation23] ss:$8 sps:$4 sm:$0xff]   ;;  %v4204_v59 = vld [vmem:[#allocation23 + $0x14] ss:$8 sps:$4 sm:$0xff]  }
 0x350   :  { %v1436_v0 = vmul.f32 %v3491_v60, %v1428_v61  ;;  %v4202_v60 = vld [vmem:[#allocation23 + $0x10] ss:$8 sps:$4 sm:$0xff]   ;;  %v4207_v61 = vld [vmem:[#allocation23 + $0x24] ss:$8 sps:$4 sm:$0xff]  }
 0x352   :  { %v1444_v1 = vadd.f32 %v3492_v62, %v1436_v0  ;;  %v4205_v62 = vld [vmem:[#allocation23 + $0x20] ss:$8 sps:$4 sm:$0xff]   ;;  %v4210_v0 = vld [vmem:[#allocation23 + $0x34] ss:$8 sps:$4 sm:$0xff]  }
 0x354   :  { %v1445_v2 = vmax.f32 %v1444_v1, 0.0  ;;  %v4208_v1 = vld [vmem:[#allocation23 + $0x30] ss:$8 sps:$4 sm:$0xff]  }
 0x356   :  { %v1446_v3 = vpack.c.bf16 %v1445_v2, %v1445_v2  ;;  %v4213_v2 = vld [vmem:[#allocation23 + $0x44] ss:$8 sps:$4 sm:$0xff]  }
 0x358   :  { %3915 = vmatmul.mubr.bf16.vlgmr.msra.gmra.mrb[12].mxu0 %v1446_v3  ;;  %v4211_v3 = vld [vmem:[#allocation23 + $0x40] ss:$8 sps:$4 sm:$0xff]  }
 0x359   :  { %1875 = vmatprep.mubr.bf16.mxu0 %v5036_v41  ;;  %1844 = vmatpush1.bf16.msra.mxu0 %v4199_v58 }
 0x35a   :  { %1845 = vmatprep.subr.bf16.mxu0 %v4204_v59 }
 0x35d   :  { %1846 = vmatpush1.bf16.msra.mxu0 %v4202_v60 }
 0x35e   :  { %1847 = vmatprep.subr.bf16.mxu0 %v4207_v61 }
 0x361   :  { %1848 = vmatpush1.bf16.msra.mxu0 %v4205_v62 }
 0x362   :  { %1849 = vmatprep.subr.bf16.mxu0 %v4210_v0 }
 0x365   :  { %1850 = vmatpush1.bf16.msra.mxu0 %v4208_v1 }
 0x366   :  { %1851 = vmatprep.subr.bf16.mxu0 %v4213_v2 }
 0x369   :  { %1852 = vmatpush1.bf16.msra.mxu0 %v4211_v3 }
 0x36a   :  { %1853 = vmatprep.subr.bf16.mxu0 %v4216_v4 }
 0x36d   :  { %1854 = vmatpush1.bf16.msra.mxu0 %v4214_v6 }
 0x36e   :  { %1855 = vmatprep.subr.bf16.mxu0 %v4219_v7 }
 0x371   :  { %1856 = vmatpush1.bf16.msra.mxu0 %v4217_v8 }
 0x372   :  { %1857 = vmatprep.subr.bf16.mxu0 %v4222_v9 }
 0x375   :  { %1858 = vmatpush1.bf16.msra.mxu0 %v4220_v10 }
 0x42b   :  { %v1545_v13 = vpop.f32.mrb[12].mxu0 }
 0x42c   :  { %v1551_v14 = vrot.slane %v1545_v13, 4  ;;  %v1558_v15 = vmul.f32 %v1545_v13, %v1545_v13  ;;  %v3916_v16 = vpop.f32.mrb[13].mxu0 }
 0x42d   :  { %v1548_v17 = vpop.f32.mrb[14].mxu0 }
 0x42e   :  { %v1552_v18 = vadd.f32 %v1551_v14, %v1545_v13  ;;  %v1559_v20 = vrot.slane %v1558_v15, 4  ;;  %v3917_v21 = vpop.f32.mrb[15].mxu0 }
 0x430   :  { %v1553_v22 = vrot.slane %v1552_v18, 2  ;;  %v1560_v23 = vadd.f32 %v1559_v20, %v1558_v15 }
 0x432   :  { %v1554_v24 = vadd.f32 %v1553_v22, %v1552_v18  ;;  %v1561_v26 = vrot.slane %v1560_v23, 2 }
 0x434   :  { %v1555_v27 = vrot.slane %v1554_v24, 1  ;;  %v1562_v28 = vadd.f32 %v1561_v26, %v1560_v23 }
 0x436   :  { %v1556_v29 = vadd.f32 %v1555_v27, %v1554_v24  ;;  %v1563_v30 = vrot.slane %v1562_v28, 1 }
 0x438   :  { %v1557_v31 = vmul.f32 0.125, %v1556_v29  ;;  %v1564_v32 = vadd.f32 %v1563_v30, %v1562_v28 }
 0x43a   :  { %v1565_v33 = vmul.f32 0.125, %v1564_v32  ;;  %v1566_v34 = vmul.f32 %v1557_v31, %v1557_v31  ;;  %v1569_v46 = vsub.f32 %v1545_v13, %v1557_v31 }
 0x43c   :  { %v1567_v38 = vsub.f32 %v1565_v33, %v1566_v34 }
 0x43e   :  { %v1568_v43 = vmax.f32 %v1567_v38, 0.0 }
 0x440   :  { %v1570_v45 = vadd.f32 1e-05, %v1568_v43 }
 0x442   :  { %4225 = vrsqrt.f32 %v1570_v45 }
 0x44c   :  { %v4226_v47 = vpop.eup %4225 }
 0x44d   :  { %v1572_v50 = vmul.f32 %v4226_v47, %v1569_v46  ;;  %v3511_v46 = vld [vmem:[#allocation20] ss:$0 sm:$0xff] }
 0x44f   :  { %v1580_v53 = vmul.f32 %v3501_v48, %v1572_v50  ;;  %v3512_v48 = vld [vmem:[#allocation22] ss:$0 sm:$0xff] }
 0x451   :  { %v1588_v54 = vadd.f32 %v3502_v51, %v1580_v53 }
 0x453   :  { %v1589_v55 = vmax.f32 %v1588_v54, 0.0 }
 0x455   :  { %v1590_v56 = vpack.c.bf16 %v1589_v55, %v1589_v55 }
 0x457   :  { %3935 = vmatmul.mubr.bf16.vlgmr.msra.gmra.mrb[8].mxu1 %v1590_v56 }
 0x52a   :  { %v1689_v11 = vpop.f32.mrb[8].mxu1 }
 0x52b   :  { %v1695_v12 = vrot.slane %v1689_v11, 4  ;;  %v1702_v13 = vmul.f32 %v1689_v11, %v1689_v11  ;;  %v3936_v14 = vpop.f32.mrb[9].mxu1 }
 0x52c   :  { %v1692_v15 = vpop.f32.mrb[10].mxu1 }
 0x52d   :  { %v1696_v16 = vadd.f32 %v1695_v12, %v1689_v11  ;;  %v1703_v17 = vrot.slane %v1702_v13, 4  ;;  %v3937_v18 = vpop.f32.mrb[11].mxu1 }
 0x52f   :  { %v1697_v20 = vrot.slane %v1696_v16, 2  ;;  %v1704_v21 = vadd.f32 %v1703_v17, %v1702_v13 }
 0x531   :  { %v1698_v22 = vadd.f32 %v1697_v20, %v1696_v16  ;;  %v1705_v23 = vrot.slane %v1704_v21, 2 }
 0x533   :  { %v1699_v24 = vrot.slane %v1698_v22, 1  ;;  %v1706_v26 = vadd.f32 %v1705_v23, %v1704_v21 }
 0x535   :  { %v1700_v27 = vadd.f32 %v1699_v24, %v1698_v22  ;;  %v1707_v28 = vrot.slane %v1706_v26, 1 }
 0x537   :  { %v1701_v29 = vmul.f32 0.125, %v1700_v27  ;;  %v1708_v30 = vadd.f32 %v1707_v28, %v1706_v26 }
 0x539   :  { %v1709_v31 = vmul.f32 0.125, %v1708_v30  ;;  %v1710_v32 = vmul.f32 %v1701_v29, %v1701_v29  ;;  %v1713_v43 = vsub.f32 %v1689_v11, %v1701_v29 }
 0x53b   :  { %v1711_v33 = vsub.f32 %v1709_v31, %v1710_v32 }
 0x53d   :  { %v1712_v34 = vmax.f32 %v1711_v33, 0.0 }
 0x53f   :  { %v1714_v38 = vadd.f32 1e-05, %v1712_v34 }
 0x541   :  { %4227 = vrsqrt.f32 %v1714_v38 }
 0x54b   :  { %v4228_v45 = vpop.eup %4227 }
 0x54c   :  { %v1716_v47 = vmul.f32 %v4228_v45, %v1713_v43 }
 0x54e   :  { %v1724_v50 = vmul.f32 %v3511_v46, %v1716_v47 }
 0x550   :  { %v1732_v51 = vadd.f32 %v3512_v48, %v1724_v50 }
 0x552   :  { %v1733_v53 = vmax.f32 %v1732_v51, 0.0 }
 0x554   :  { %v1734_v54 = vpack.c.bf16 %v1733_v53, %v1733_v53 }
 0x556   :  { %1876 = vmatmul.mubr.bf16.vlgmr.msra.gmra.mrb[16].mxu0 %v1734_v54 }
 0x557   :  { %4845 = shalt.err (!%p4842_p10)  }
 0x558   :  { %s4846_s26 = scalar_lea.vmem %s408_s22, 8000  ;;  %p4851_p12 = scmp.lt.s32.totalorder %s408_s22, %s408_s22 }
 0x559   :  { %p4847_p11 = scmp.ne.s32.totalorder %s408_s22, %s4846_s26  ;;  %p4852_p13 = scmp.lt.s32.totalorder %s4846_s26, %s4846_s26 }
 0x55b   :  { %p4853_p0 = por %p4852_p13, %p4851_p12 }
 0x55d   :  { %p4854_p1 = pnand %p4853_p0, %p4847_p11 }
 0x55f   :  { %4857 = shalt.err (!%p4854_p1)  }
 0x560   :  { %s5596_s21 = sld [smem:[#allocation75_spill]] }
 0x561   :  { %410 = dma.hbm_to_vmem [thread:$0]  %s5595_s27, 8000, %s408_s22, [#allocation4] }
 0x566   :  { %s4858_s8 = scalar_lea.hbm %s5596_s21, 2240 }
 0x567   :  { %p4859_p2 = scmp.ne.s32.totalorder %s5596_s21, %s4858_s8  ;;  %p4862_p3 = scmp.lt.u32.totalorder %s4858_s8, %s5596_s21 }
 0x569   :  { %p4864_p4 = pnand %p4862_p3, %p4859_p2 }
 0x56b   :  { %4867 = shalt.err (!%p4864_p4)  }
 0x56c   :  { %s4868_s17 = scalar_lea.vmem %s420_s24, 2240  ;;  %p4873_p6 = scmp.lt.s32.totalorder %s420_s24, %s420_s24 }
 0x56d   :  { %p4869_p5 = scmp.ne.s32.totalorder %s420_s24, %s4868_s17  ;;  %p4874_p7 = scmp.lt.s32.totalorder %s4868_s17, %s4868_s17 }
 0x56f   :  { %p4875_p8 = por %p4874_p7, %p4873_p6 }
 0x571   :  { %p4876_p9 = pnand %p4875_p8, %p4869_p5 }
 0x573   :  { %4879 = shalt.err (!%p4876_p9)  }
 0x574   :  { %s5597_s28 = sld [smem:[#allocation72_spill]]  ;;  %v1753_v55 = vlaneseq  ;;  %s5598_s6 = sld [smem:[#allocation68_spill]] }
 0x575   :  { %422 = dma.hbm_to_vmem [thread:$0]  %s5596_s21, 2240, %s420_s24, [#allocation4 + $0x1] }
 0x576   :  { %v1754_v56 = vshrl.u32 %v1753_v55, 7 }
 0x578   :  { %v1755_v57 = vsub.s32 0, %v1754_v56  ;;  %v1759_v59 = vsub.s32 1, %v1754_v56 }
 0x57a   :  { %v1751_v58 = vld [vmem:[%s5597_s28] sm:$0x3] }
 0x57b   :  { %v1756_v60 = vrot.slane %v1751_v58, %v1755_v57  ;;  %v1760_v61 = vrot.slane %v1751_v58, %v1759_v59  ;;  %v1903_v21 = vld [vmem:[%s5598_s6] sm:$0xff] }
 0x629   :  { %v1877_v62 = vpop.f32.mrb[16].mxu0 }
 0x62a   :  { %v1878_v0 = vadd.f32 %v1877_v62, %v1756_v60  ;;  %v1879_v1 = vpop.f32.mrb[17].mxu0 }
 0x62b   :  { %v1880_v2 = vadd.f32 %v1879_v1, %v1760_v61  ;;  %v1881_v3 = vpop.f32.mrb[18].mxu0 }
 0x62c   :  { %1898 = vst.msk [vmem:[#allocation41] sm:$0xff] %vm1128_vm4, %v1878_v0  ;;  %v1882_v4 = vpop.f32.mrb[19].mxu0 }
 0x62d   :  { %v1885_v6 = vmin.f32 %v1880_v2, 20.0  ;;  %vm1884_vm7 = vcmp.gt.f32.partialorder %v1880_v2, 20.0 }
 0x62f   :  { %v1886_v7 = vmul.f32 1.442695, %v1885_v6 }
 0x631   :  { %4229 = vpow2.f32 %v1886_v7 }
 0x63b   :  { %v4230_v8 = vpop.eup %4229 }
 0x63c   :  { %v1888_v9 = vadd.f32 1.0, %v4230_v8  ;;  %v1891_v10 = vmul.f32 -0.5, %v4230_v8  ;;  %v1894_v12 = vand.u32 2147483647, %v4230_v8 }
 0x63e   :  { %4231 = vlog2.f32 %v1888_v9  ;;  %v1892_v11 = vadd.f32 1.0, %v1891_v10  ;;  %vm1895_vm6 = vcmp.lt.f32.partialorder %v1894_v12, 0.0004427343 }
 0x640   :  { %v1893_v15 = vmul.f32 %v4230_v8, %v1892_v11 }
 0x648   :  { %v4232_v13 = vpop.eup %4231 }
 0x649   :  { %v1890_v14 = vmul.f32 0.6931472, %v4232_v13 }
 0x64b   :  { %v1896_v16 = vsel %vm1895_vm6, %v1893_v15, %v1890_v14 }
 0x64c   :  { %v1897_v17 = vsel %vm1884_vm7, %v1880_v2, %v1896_v16 }
 0x64d   :  { %1899 = vst.msk [vmem:[#allocation43] sm:$0xff] %vm1128_vm4, %v1897_v17  ;;  %v1900_v18 = vmul.f32 0.5, %v1897_v17 }
 0x64f   :  { %v1901_v20 = vmul.f32 1.442695, %v1900_v18 }
 0x651   :  { %4233 = vpow2.f32 %v1901_v20 }
 0x65b   :  { %v4234_v22 = vpop.eup %4233 }
 0x65c   :  { %v1904_v23 = vmul.f32 %v4234_v22, %v1903_v21 }
 0x65e   :  { %v5463_v24 = vadd.f32 %v1904_v23, %v1878_v0 }
 0x65f   :  { %4970 = dma.done.wait [#allocation4], 8000 }
 0x660   :  { %4971 = vsyncadd [#allocation4], 4294959296 }
 0x661   :  { %4972 = dma.done.wait [#allocation4 + $0x1], 2240 }
 0x662   :  { %4973 = vsyncadd [#allocation4 + $0x1], 4294965056  ;;  %2454 = vmatprep.mubr.bf16.mxu1 %v5344_v35  ;;  %2494 = vmatprep.mubr.bf16.mxu0 %v5346_v36  ;;  %v4235_v26 = vld [vmem:[#allocation2 + $0x40] sm:$0xff]   ;;  %v4239_v30 = vld [vmem:[#allocation2 + $0x48] sm:$0xff]   ;;  %s5599_s3 = sld [smem:[#allocation80_spill]]  ;;  %s5041_s19 = smov [#allocation41]  }
 0x663   :  { %v4236_v27 = vld [vmem:[#allocation2 + $0xc0] sm:$0xff]   ;;  %3761 = vmatprep.subr.bf16.mxu1 %v4235_v26  ;;  %v4240_v31 = vld [vmem:[#allocation2 + $0xc8] sm:$0xff]   ;;  %v4243_v34 = vld [vmem:[#allocation2 + $0x50] sm:$0xff]   ;;  %s3323_s29 = sshll.u32 %s5041_s19, 4  ;;  %s3324_s29 = int_to_ptr.vmem [resolvable:$true] %s3323_s29 }
 0x664   :  { %v4237_v28 = vld [vmem:[#allocation2] sm:$0xff]   ;;  %3783 = vmatprep.subr.bf16.mxu0 %v4236_v27  ;;  %v4241_v32 = vld [vmem:[#allocation2 + $0x8] sm:$0xff]   ;;  %v4244_v35 = vld [vmem:[#allocation2 + $0xd0] sm:$0xff]   ;;  %s4880_s0 = scalar_lea.vmem %s3324_s29, 128  ;;  %p4885_p11 = scmp.lt.s32.totalorder %s3324_s29, %s3324_s29 }
 0x665   :  { %v4238_v29 = vld [vmem:[#allocation2 + $0x80] sm:$0xff]   ;;  %3762 = vmatpush3.bf16.msra.mxu1 %v4237_v28  ;;  %v4242_v33 = vld [vmem:[#allocation2 + $0x88] sm:$0xff]   ;;  %v4245_v36 = vld [vmem:[#allocation2 + $0x10] sm:$0xff]   ;;  %p4881_p10 = scmp.ne.s32.totalorder %s3324_s29, %s4880_s0  ;;  %p4886_p12 = scmp.lt.s32.totalorder %s4880_s0, %s4880_s0 }
 0x666   :  { %3784 = vmatpush3.bf16.msra.mxu0 %v4238_v29  ;;  %3763 = vmatprep.subr.bf16.mxu1 %v4239_v30  ;;  %v4246_v38 = vld [vmem:[#allocation2 + $0x90] sm:$0xff]   ;;  %v4247_v43 = vld [vmem:[#allocation2 + $0x58] sm:$0xff]   ;;  %v4251_v48 = vld [vmem:[#allocation2 + $0x60] sm:$0xff]  }
 0x667   :  { %3785 = vmatprep.subr.bf16.mxu0 %v4240_v31  ;;  %v4248_v45 = vld [vmem:[#allocation2 + $0xd8] sm:$0xff]   ;;  %v4252_v50 = vld [vmem:[#allocation2 + $0xe0] sm:$0xff]   ;;  %v4255_v54 = vld [vmem:[#allocation2 + $0x68] sm:$0xff]   ;;  %p4887_p13 = por %p4886_p12, %p4885_p11 }
 0x668   :  { %v4249_v46 = vld [vmem:[#allocation2 + $0x18] sm:$0xff]   ;;  %v4253_v51 = vld [vmem:[#allocation2 + $0x20] sm:$0xff]   ;;  %v4256_v55 = vld [vmem:[#allocation2 + $0xe8] sm:$0xff]  }
 0x669   :  { %3764 = vmatpush3.bf16.msra.mxu1 %v4241_v32  ;;  %v4250_v47 = vld [vmem:[#allocation2 + $0x98] sm:$0xff]   ;;  %v4254_v53 = vld [vmem:[#allocation2 + $0xa0] sm:$0xff]   ;;  %v4257_v56 = vld [vmem:[#allocation2 + $0x28] sm:$0xff]   ;;  %p4888_p0 = pnand %p4887_p13, %p4881_p10 }
 0x66a   :  { %3786 = vmatpush3.bf16.msra.mxu0 %v4242_v33  ;;  %3765 = vmatprep.subr.bf16.mxu1 %v4243_v34  ;;  %v4258_v57 = vld [vmem:[#allocation2 + $0xa8] sm:$0xff]   ;;  %v4259_v58 = vld [vmem:[#allocation2 + $0x70] sm:$0xff]   ;;  %v4263_v62 = vld [vmem:[#allocation2 + $0x78] sm:$0xff]  }
 0x66b   :  { %3787 = vmatprep.subr.bf16.mxu0 %v4244_v35  ;;  %v4260_v59 = vld [vmem:[#allocation2 + $0xf0] sm:$0xff]   ;;  %v4264_v0 = vld [vmem:[#allocation2 + $0xf8] sm:$0xff]   ;;  %v4267_v3 = vld [vmem:[#allocation2 + $0x140] sm:$0xff]  }
 0x66c   :  { %v4261_v60 = vld [vmem:[#allocation2 + $0x30] sm:$0xff]   ;;  %v4265_v1 = vld [vmem:[#allocation2 + $0x38] sm:$0xff]   ;;  %v4268_v4 = vld [vmem:[#allocation2 + $0x100] sm:$0xff]  }
 0x66d   :  { %3766 = vmatpush3.bf16.msra.mxu1 %v4245_v36  ;;  %v4262_v61 = vld [vmem:[#allocation2 + $0xb0] sm:$0xff]   ;;  %v4266_v2 = vld [vmem:[#allocation2 + $0xb8] sm:$0xff]   ;;  %v4269_v6 = vld [vmem:[#allocation2 + $0x180] sm:$0xff]  }
 0x66e   :  { %3788 = vmatpush3.bf16.msra.mxu0 %v4246_v38  ;;  %3767 = vmatprep.subr.bf16.mxu1 %v4247_v43  ;;  %v4270_v7 = vld [vmem:[#allocation2 + $0x148] sm:$0xff]   ;;  %v4273_v10 = vld [vmem:[#allocation2 + $0x150] sm:$0xff]   ;;  %v4278_v13 = vld [vmem:[#allocation2 + $0x198] sm:$0xff]  }
 0x66f   :  { %3789 = vmatprep.subr.bf16.mxu0 %v4248_v45  ;;  %v4271_v8 = vld [vmem:[#allocation2 + $0x108] sm:$0xff]   ;;  %v4274_v11 = vld [vmem:[#allocation2 + $0x110] sm:$0xff]   ;;  %v4279_v14 = vld [vmem:[#allocation2 + $0x160] sm:$0xff]  }
 0x670   :  { %v4272_v9 = vld [vmem:[#allocation2 + $0x188] sm:$0xff]   ;;  %v4275_v12 = vld [vmem:[#allocation2 + $0x190] sm:$0xff]   ;;  %v4281_v15 = vld [vmem:[#allocation2 + $0x1a0] sm:$0xff]  }
 0x671   :  { %3768 = vmatpush3.bf16.msra.mxu1 %v4249_v46  ;;  %v4283_v16 = vld [vmem:[#allocation2 + $0x128] sm:$0xff]   ;;  %v4285_v18 = vld [vmem:[#allocation2 + $0x170] sm:$0xff]   ;;  %v4288_v22 = vld [vmem:[#allocation2 + $0x178] sm:$0xff]  }
 0x672   :  { %3790 = vmatpush3.bf16.msra.mxu0 %v4250_v47  ;;  %3769 = vmatprep.subr.bf16.mxu1 %v4251_v48  ;;  %v4284_v17 = vld [vmem:[#allocation2 + $0x1a8] sm:$0xff]   ;;  %v4286_v20 = vld [vmem:[#allocation2 + $0x130] sm:$0xff]   ;;  %v4289_v23 = vld [vmem:[#allocation2 + $0x138] sm:$0xff]  }
 0x673   :  { %3791 = vmatprep.subr.bf16.mxu0 %v4252_v50  ;;  %v4287_v21 = vld [vmem:[#allocation2 + $0x1b0] sm:$0xff]   ;;  %v4290_v26 = vld [vmem:[#allocation2 + $0x1b8] sm:$0xff]   ;;  %v4292_v28 = vld [vmem:[#allocation2 + $0x1c0] sm:$0xff]  }
 0x674   :  { %v4291_v27 = vld [vmem:[#allocation3 + $0x40] sm:$0xff]   ;;  %v4294_v30 = vld [vmem:[#allocation3 + $0x48] sm:$0xff]   ;;  %v4295_v31 = vld [vmem:[#allocation2 + $0x1c8] sm:$0xff]  }
 0x675   :  { %3770 = vmatpush3.bf16.msra.mxu1 %v4253_v51  ;;  %v4293_v29 = vld [vmem:[#allocation3] sm:$0xff]   ;;  %v4296_v32 = vld [vmem:[#allocation3 + $0x8] sm:$0xff]   ;;  %v4297_v33 = vld [vmem:[#allocation3 + $0x50] sm:$0xff]  }
 0x676   :  { %3792 = vmatpush3.bf16.msra.mxu0 %v4254_v53  ;;  %3771 = vmatprep.subr.bf16.mxu1 %v4255_v54  ;;  %v4298_v34 = vld [vmem:[#allocation2 + $0x1d0] sm:$0xff]   ;;  %v4299_v35 = vld [vmem:[#allocation3 + $0x10] sm:$0xff]   ;;  %v4301_v38 = vld [vmem:[#allocation2 + $0x1d8] sm:$0xff]  }
 0x677   :  { %3793 = vmatprep.subr.bf16.mxu0 %v4256_v55  ;;  %v4300_v36 = vld [vmem:[#allocation3 + $0x58] sm:$0xff]   ;;  %v4303_v43 = vld [vmem:[#allocation3 + $0x60] sm:$0xff]   ;;  %v4304_v45 = vld [vmem:[#allocation2 + $0x1e0] sm:$0xff]  }
 0x678   :  { %v4305_v46 = vld [vmem:[#allocation3 + $0x20] sm:$0xff]   ;;  %v4306_v47 = vld [vmem:[#allocation3 + $0x68] sm:$0xff]   ;;  %v4307_v51 = vld [vmem:[#allocation2 + $0x1e8] sm:$0xff]  }
 0x679   :  { %3772 = vmatpush3.bf16.msra.mxu1 %v4257_v56  ;;  %v4308_v48 = vld [vmem:[#allocation3 + $0x28] sm:$0xff]   ;;  %v4309_v53 = vld [vmem:[#allocation3 + $0x70] sm:$0xff]   ;;  %v4312_v55 = vld [vmem:[#allocation3 + $0x78] sm:$0xff]  }
 0x67a   :  { %3794 = vmatpush3.bf16.msra.mxu0 %v4258_v57  ;;  %3773 = vmatprep.subr.bf16.mxu1 %v4259_v58  ;;  %v4311_v54 = vld [vmem:[#allocation3 + $0x30] sm:$0xff]   ;;  %v4314_v56 = vld [vmem:[#allocation3 + $0x38] sm:$0xff]   ;;  %v4315_v58 = vld [vmem:[#allocation25 + $0x8] sm:$0xff]  }
 0x67b   :  { %3795 = vmatprep.subr.bf16.mxu0 %v4260_v59  ;;  %v4313_v57 = vld [vmem:[#allocation25] sm:$0xff]   ;;  %v4317_v59 = vld [vmem:[#allocation3 + $0x88] ss:$0 sps:$4 sm:$0x11]  }
 0x67d   :  { %3774 = vmatpush3.bf16.msra.mxu1 %v4261_v60  ;;  %v2778_v60 = vand.u32 %v4317_v59, %v5421_v49  ;;  %v4320_v49 = vld [vmem:[#allocation29 + $0x10] sm:$0xff]  }
 0x67e   :  { %3796 = vmatpush3.bf16.msra.mxu0 %v4262_v61  ;;  %3775 = vmatprep.subr.bf16.mxu1 %v4263_v62  ;;  %v4321_v61 = vld [vmem:[#allocation29 + $0x18] sm:$0xff]   ;;  %v4323_v62 = vld [vmem:[#allocation29 + $0x28] sm:$0xff]  }
 0x67f   :  { %3797 = vmatprep.subr.bf16.mxu0 %v4264_v0  ;;  %v4324_v0 = vld [vmem:[#allocation29 + $0x30] sm:$0xff]  }
 0x681   :  { %3776 = vmatpush3.bf16.msra.mxu1 %v4265_v1  ;;  %v4325_v1 = vld [vmem:[#allocation29 + $0x38] sm:$0xff]  }
 0x682   :  { %3798 = vmatpush3.bf16.msra.mxu0 %v4266_v2  ;;  %3805 = vmatprep.subr.bf16.mxu1 %v4267_v3 }
 0x683   :  { %2542 = vmatprep.subr.bf16.mxu0 %v5036_v41 }
 0x684   :  { %2455 = vmatmul.mubr.bf16.vlgmr.msra.gmra.mrb[12].mxu1 %v5348_v37  ;;  %v4276_v37 = vld [vmem:[#allocation2 + $0x158] sm:$0xff]  }
 0x685   :  { %2495 = vmatmul.mubr.bf16.vlgmr.msra.gmra.mrb[20].mxu0 %v5350_v39  ;;  %3806 = vmatpush3.bf16.msra.mxu1 %v4268_v4  ;;  %v4277_v39 = vld [vmem:[#allocation2 + $0x118] sm:$0xff]  }
 0x686   :  { %2543 = vmatpush1.bf16.msra.mxu0 %v4269_v6  ;;  %3807 = vmatprep.subr.bf16.mxu1 %v4270_v7 }
 0x687   :  { %2544 = vmatprep.subr.bf16.mxu0 %v5036_v41  ;;  %2534 = vmatprep.mubr.bf16.mxu1 %v5362_v63  ;;  %v4280_v63 = vld [vmem:[#allocation2 + $0x120] sm:$0xff]  }
 0x688   :  { %3592 = vmatprep.mubr.msk.bf16.mxu0 %vm948_vm0, %v5383_v19  ;;  %v4282_v19 = vld [vmem:[#allocation2 + $0x168] sm:$0xff]  }
 0x689   :  { %3808 = vmatpush3.bf16.msra.mxu1 %v4271_v8 }
 0x68a   :  { %2545 = vmatpush1.bf16.msra.mxu0 %v4272_v9  ;;  %3809 = vmatprep.subr.bf16.mxu1 %v4273_v10 }
 0x68b   :  { %2546 = vmatprep.subr.bf16.mxu0 %v5036_v41 }
 0x68d   :  { %3810 = vmatpush3.bf16.msra.mxu1 %v4274_v11 }
 0x68e   :  { %2547 = vmatpush1.bf16.msra.mxu0 %v4275_v12  ;;  %3811 = vmatprep.subr.bf16.mxu1 %v4276_v37 }
 0x68f   :  { %2548 = vmatprep.subr.bf16.mxu0 %v5036_v41 }
 0x691   :  { %3812 = vmatpush3.bf16.msra.mxu1 %v4277_v39 }
 0x692   :  { %2549 = vmatpush1.bf16.msra.mxu0 %v4278_v13  ;;  %3813 = vmatprep.subr.bf16.mxu1 %v4279_v14 }
 0x693   :  { %2550 = vmatprep.subr.bf16.mxu0 %v5036_v41 }
 0x695   :  { %3814 = vmatpush3.bf16.msra.mxu1 %v4280_v63 }
 0x696   :  { %2551 = vmatpush1.bf16.msra.mxu0 %v4281_v15  ;;  %3815 = vmatprep.subr.bf16.mxu1 %v4282_v19 }
 0x697   :  { %2552 = vmatprep.subr.bf16.mxu0 %v5036_v41 }
 0x699   :  { %3816 = vmatpush3.bf16.msra.mxu1 %v4283_v16 }
 0x69a   :  { %2553 = vmatpush1.bf16.msra.mxu0 %v4284_v17  ;;  %3817 = vmatprep.subr.bf16.mxu1 %v4285_v18 }
 0x69b   :  { %2554 = vmatprep.subr.bf16.mxu0 %v5036_v41 }
 0x69d   :  { %3818 = vmatpush3.bf16.msra.mxu1 %v4286_v20 }
 0x69e   :  { %2555 = vmatpush1.bf16.msra.mxu0 %v4287_v21  ;;  %3819 = vmatprep.subr.bf16.mxu1 %v4288_v22 }
 0x69f   :  { %2556 = vmatprep.subr.bf16.mxu0 %v5036_v41 }
 0x6a1   :  { %3820 = vmatpush3.bf16.msra.mxu1 %v4289_v23 }
 0x6a2   :  { %2557 = vmatpush1.bf16.msra.mxu0 %v4290_v26  ;;  %3830 = vmatprep.subr.bf16.mxu1 %v4291_v27 }
 0x6a3   :  { %2558 = vmatprep.subr.bf16.mxu0 %v5036_v41 }
 0x6a4   :  { %2535 = vmatmul.mubr.bf16.vlgmr.msra.gmra.mrb[16].mxu1 %v5368_v5  ;;  %v4302_v5 = vld [vmem:[#allocation3 + $0x18] sm:$0xff]  }
 0x6a5   :  { %3831 = vmatpush3.bf16.msra.mxu1 %v4293_v29  ;;  %2812 = vmatprep.mubr.bf16.mxu1 %v5391_v25  ;;  %v4310_v25 = vld [vmem:[#allocation2 + $0x1f0] ss:$0 sps:$4 sm:$0xff]  }
 0x6a6   :  { %2559 = vmatpush1.bf16.msra.mxu0 %v4292_v28  ;;  %3832 = vmatprep.subr.bf16.mxu1 %v4294_v30  ;;  %v2420_v50 = vsel %vm952_vm1, %v4310_v25, 0 }
 0x6a7   :  { %2560 = vmatprep.subr.bf16.mxu0 %v5036_v41 }
 0x6a9   :  { %3833 = vmatpush3.bf16.msra.mxu1 %v4296_v32 }
 0x6aa   :  { %2561 = vmatpush1.bf16.msra.mxu0 %v4295_v31  ;;  %3834 = vmatprep.subr.bf16.mxu1 %v4297_v33 }
 0x6ab   :  { %2562 = vmatprep.subr.bf16.mxu0 %v5036_v41 }
 0x6ad   :  { %3835 = vmatpush3.bf16.msra.mxu1 %v4299_v35 }
 0x6ae   :  { %2563 = vmatpush1.bf16.msra.mxu0 %v4298_v34  ;;  %3836 = vmatprep.subr.bf16.mxu1 %v4300_v36 }
 0x6af   :  { %2564 = vmatprep.subr.bf16.mxu0 %v5036_v41 }
 0x6b1   :  { %3837 = vmatpush3.bf16.msra.mxu1 %v4302_v5 }
 0x6b2   :  { %2565 = vmatpush1.bf16.msra.mxu0 %v4301_v38  ;;  %3838 = vmatprep.subr.bf16.mxu1 %v4303_v43 }
 0x6b3   :  { %2566 = vmatprep.subr.bf16.mxu0 %v5036_v41 }
 0x6b5   :  { %3839 = vmatpush3.bf16.msra.mxu1 %v4305_v46 }
 0x6b6   :  { %2567 = vmatpush1.bf16.msra.mxu0 %v4304_v45  ;;  %3840 = vmatprep.subr.bf16.mxu1 %v4306_v47 }
 0x6b7   :  { %2568 = vmatprep.subr.bf16.mxu0 %v5036_v41 }
 0x6b9   :  { %3841 = vmatpush3.bf16.msra.mxu1 %v4308_v48 }
 0x6ba   :  { %2569 = vmatpush1.bf16.msra.mxu0 %v4307_v51  ;;  %3842 = vmatprep.subr.bf16.mxu1 %v4309_v53 }
 0x6bb   :  { %2570 = vmatprep.subr.bf16.mxu0 %v5036_v41  ;;  %v1914_v41 = vpack.c.bf16 %v5463_v24, %v5463_v24  ;;  %v4319_v24 = vld [vmem:[#allocation29 + $0x8] sm:$0xff]  }
 0x6bd   :  { %3843 = vmatpush3.bf16.msra.mxu1 %v4311_v54 }
 0x6be   :  { %2571 = vmatpush1.bf16.msra.mxu0 %v2420_v50  ;;  %3844 = vmatprep.subr.bf16.mxu1 %v4312_v55 }
 0x6bf   :  { %3938 = vmatprep.subr.bf16.mxu0 %v5037_v42 }
 0x6c1   :  { %2575 = vmatmul.mubr.bf16.vlgmr.msra.gmra.mrb[24].mxu0 %v5403_v40  ;;  %3845 = vmatpush3.bf16.msra.mxu1 %v4314_v56  ;;  %v4316_v40 = vld [vmem:[#allocation3 + $0x80] sm:$0xff]  }
 0x6c2   :  { %3939 = vmatpush3.bf16.msra.mxu0 %v4313_v57  ;;  %3942 = vmatprep.mubr.msk.bf16.mxu0 %vm5038_vm2, %v5037_v42  ;;  %v3615_v57 = vld [vmem:[#allocation26] ss:$0 sm:$0xff] }
 0x6c3   :  { %3940 = vmatprep.subr.bf16.mxu0 %v5037_v42  ;;  %3954 = vmatprep.subr.bf16.mxu1 %v5037_v42 }
 0x6c4   :  { %2813 = vmatmul.mubr.bf16.vlgmr.msra.gmra.mrb[20].mxu1 %v5407_v44  ;;  %v4318_v44 = vld [vmem:[#allocation29] sm:$0xff]  }
 0x6c5   :  { %3970 = vmatprep.mubr.msk.bf16.mxu1 %vm5038_vm2, %v5037_v42  ;;  %3955 = vmatpush3.bf16.msra.mxu1 %v4318_v44 }
 0x6c6   :  { %3941 = vmatpush3.bf16.msra.mxu0 %v4315_v58  ;;  %3956 = vmatprep.subr.bf16.mxu1 %v5037_v42 }
 0x6c7   :  { %3946 = vmatprep.subr.bf16.mxu0 %v5037_v42 }
 0x6c9   :  { %3957 = vmatpush3.bf16.msra.mxu1 %v4319_v24  ;;  %v4326_v24 = vld [vmem:[#allocation34] sm:$0xff]  }
 0x6ca   :  { %3958 = vmatprep.subr.bf16.mxu1 %v5037_v42 }
 0x6cd   :  { %3943 = vmatmul.mubr.msk.bf16.vlgmr.msra.gmra.mrb[24].mxu0 %vm1128_vm4, %v1914_v41  ;;  %3959 = vmatpush3.bf16.msra.mxu1 %v4320_v49  ;;  %v3616_v41 = vld [vmem:[#allocation28] ss:$0 sm:$0xff]  ;;  %v4327_v49 = vld [vmem:[#allocation34 + $0x8] sm:$0xff]  }
 0x6ce   :  { %3947 = vmatpush3.bf16.msra.mxu0 %v4316_v40  ;;  %3950 = vmatprep.mubr.msk.bf16.mxu0 %vm5038_vm2, %v5037_v42 }
 0x6cf   :  { %3948 = vmatprep.subr.bf16.mxu0 %v5037_v42  ;;  %3960 = vmatprep.subr.bf16.mxu1 %v5037_v42 }
 0x6d1   :  { %3961 = vmatpush3.bf16.msra.mxu1 %v4321_v61  ;;  %v4328_v61 = vld [vmem:[#allocation34 + $0x10] sm:$0xff]  }
 0x6d2   :  { %3949 = vmatpush3.bf16.msra.mxu0 %v2778_v60  ;;  %3962 = vmatprep.subr.bf16.mxu1 %v5037_v42 }
 0x6d3   :  { %3974 = vmatprep.subr.bf16.mxu0 %v5037_v42 }
 0x6d9   :  { %3951 = vmatmul.mubr.msk.bf16.vlgmr.msra.gmra.mrb[24].mxu0 %vm1315_vm5, %v5430_v52  ;;  %v4322_v52 = vld [vmem:[#allocation29 + $0x20] sm:$0xff]  }
 0x6da   :  { %3990 = vmatprep.mubr.msk.bf16.mxu0 %vm5038_vm2, %v5037_v42  ;;  %3963 = vmatpush3.bf16.msra.mxu1 %v4322_v52  ;;  %v4329_v52 = vld [vmem:[#allocation34 + $0x18] sm:$0xff]  }
 0x6db   :  { %3964 = vmatprep.subr.bf16.mxu1 %v5037_v42  ;;  %3975 = vmatpush3.bf16.msra.mxu0 %v4326_v24 }
 0x6dc   :  { %3976 = vmatprep.subr.bf16.mxu0 %v5037_v42 }
 0x6de   :  { %3965 = vmatpush3.bf16.msra.mxu1 %v4323_v62  ;;  %v4330_v62 = vld [vmem:[#allocation34 + $0x20] sm:$0xff]  }
 0x6df   :  { %3966 = vmatprep.subr.bf16.mxu1 %v5037_v42  ;;  %3977 = vmatpush3.bf16.msra.mxu0 %v4327_v49 }
 0x6e0   :  { %3978 = vmatprep.subr.bf16.mxu0 %v5037_v42 }
 0x6e2   :  { %3967 = vmatpush3.bf16.msra.mxu1 %v4324_v0  ;;  %v4331_v0 = vld [vmem:[#allocation34 + $0x28] sm:$0xff]  }
 0x6e3   :  { %3968 = vmatprep.subr.bf16.mxu1 %v5037_v42  ;;  %3979 = vmatpush3.bf16.msra.mxu0 %v4328_v61 }
 0x6e4   :  { %3980 = vmatprep.subr.bf16.mxu0 %v5037_v42 }
 0x6e6   :  { %3969 = vmatpush3.bf16.msra.mxu1 %v4325_v1  ;;  %v4332_v1 = vld [vmem:[#allocation34 + $0x30] sm:$0xff]  }
 0x6e7   :  { %3994 = vmatprep.subr.bf16.mxu1 %v5037_v42  ;;  %3981 = vmatpush3.bf16.msra.mxu0 %v4329_v52 }
 0x6e8   :  { %3982 = vmatprep.subr.bf16.mxu0 %v5037_v42 }
 0x6eb   :  { %3983 = vmatpush3.bf16.msra.mxu0 %v4330_v62 }
 0x6ec   :  { %3984 = vmatprep.subr.bf16.mxu0 %v5037_v42 }
 0x6ef   :  { %3985 = vmatpush3.bf16.msra.mxu0 %v4331_v0 }
 0x6f0   :  { %3986 = vmatprep.subr.bf16.mxu0 %v5037_v42 }
 0x6f3   :  { %3987 = vmatpush3.bf16.msra.mxu0 %v4332_v1 }
 0x6f4   :  { %3988 = vmatprep.subr.bf16.mxu0 %v5037_v42 }
 0x757   :  { %v3777_v2 = vpop.f32.mrb[12].mxu1 }
 0x758   :  { %v3799_v3 = vpop.f32.mrb[20].mxu0  ;;  %v3778_v4 = vpop.f32.mrb[13].mxu1 }
 0x759   :  { %v3779_v6 = vadd.f32 %v3778_v4, %v3777_v2  ;;  %v3800_v7 = vpop.f32.mrb[21].mxu0  ;;  %v3780_v8 = vpop.f32.mrb[14].mxu1  ;;  %v4333_v2 = vld [vmem:[#allocation34 + $0x38] sm:$0xff]  }
 0x75a   :  { %v3801_v9 = vadd.f32 %v3800_v7, %v3799_v3  ;;  %v3802_v10 = vpop.f32.mrb[22].mxu0  ;;  %v3781_v11 = vpop.f32.mrb[15].mxu1  ;;  %3989 = vmatpush3.bf16.msra.mxu0 %v4333_v2 }
 0x75b   :  { %v3803_v12 = vpop.f32.mrb[23].mxu0 }
 0x75c   :  { %v2497_v37 = vadd.f32 %v3801_v9, %v3779_v6 }
 0x777   :  { %v3821_v39 = vpop.f32.mrb[16].mxu1 }
 0x778   :  { %v3822_v13 = vpop.f32.mrb[17].mxu1 }
 0x779   :  { %v3823_v14 = vadd.f32 %v3822_v13, %v3821_v39  ;;  %v3824_v63 = vpop.f32.mrb[18].mxu1 }
 0x77a   :  { %v3825_v15 = vpop.f32.mrb[19].mxu1 }
 0x77b   :  { %v2537_v19 = vadd.f32 %v3823_v14, %v2497_v37 }
 0x797   :  { %v3846_v16 = vpop.f32.mrb[20].mxu1 }
 0x798   :  { %v3847_v17 = vpop.f32.mrb[21].mxu1 }
 0x799   :  { %v3848_v18 = vadd.f32 %v3847_v17, %v3846_v16  ;;  %v3849_v20 = vpop.f32.mrb[22].mxu1 }
 0x79a   :  { %v3850_v21 = vpop.f32.mrb[23].mxu1 }
 0x79b   :  { %v4016_v22 = vadd.f32 %v3848_v18, %v2537_v19 }
 0x7ac   :  { %v2854_v23 = vpop.f32.mrb[24].mxu0 }
 0x7ad   :  { %v4017_v26 = vadd.f32 %v4016_v22, %v2854_v23  ;;  %v3952_v27 = vpop.f32.mrb[25].mxu0 }
 0x7ae   :  { %v2857_v28 = vpop.f32.mrb[26].mxu0 }
 0x7af   :  { %v2861_v29 = vrot.slane %v4017_v26, 4  ;;  %v2868_v30 = vmul.f32 %v4017_v26, %v4017_v26  ;;  %v3953_v31 = vpop.f32.mrb[27].mxu0  ;;  %v3625_v28 = vld [vmem:[#allocation31] ss:$0 sm:$0xff] }
 0x7b1   :  { %v2862_v32 = vadd.f32 %v4017_v26, %v2861_v29  ;;  %v2869_v33 = vrot.slane %v2868_v30, 4 }
 0x7b3   :  { %v2863_v34 = vrot.slane %v2862_v32, 2  ;;  %v2870_v35 = vadd.f32 %v2869_v33, %v2868_v30  ;;  %v3626_v30 = vld [vmem:[#allocation32] ss:$0 sm:$0xff] }
 0x7b5   :  { %v2864_v36 = vadd.f32 %v2863_v34, %v2862_v32  ;;  %v2871_v38 = vrot.slane %v2870_v35, 2 }
 0x7b7   :  { %v2865_v5 = vrot.slane %v2864_v36, 1  ;;  %v2872_v43 = vadd.f32 %v2871_v38, %v2870_v35  ;;  %v4334_v35 = vld [vmem:[%s5599_s3] sm:$0xff]   ;;  %v4336_v38 = vld [vmem:[%s5599_s3 + $0x10] sm:$0xff]  }
 0x7b9   :  { %v2866_v25 = vadd.f32 %v2865_v5, %v2864_v36  ;;  %v2873_v45 = vrot.slane %v2872_v43, 1  ;;  %v4335_v36 = vld [vmem:[%s5599_s3 + $0x8] sm:$0xff]   ;;  %v4337_v5 = vld [vmem:[%s5599_s3 + $0x18] sm:$0xff]  }
 0x7bb   :  { %v2867_v46 = vmul.f32 0.125, %v2866_v25  ;;  %v2874_v47 = vadd.f32 %v2873_v45, %v2872_v43  ;;  %v4338_v43 = vld [vmem:[%s5599_s3 + $0x20] sm:$0xff]   ;;  %v4339_v25 = vld [vmem:[%s5599_s3 + $0x28] sm:$0xff]   ;;  %v4340_v45 = vld [vmem:[%s5599_s3 + $0x30] sm:$0xff]  }
 0x7bd   :  { %v2875_v48 = vmul.f32 0.125, %v2874_v47  ;;  %v2876_v50 = vmul.f32 %v2867_v46, %v2867_v46  ;;  %v2879_v55 = vsub.f32 %v4017_v26, %v2867_v46  ;;  %v4341_v46 = vld [vmem:[%s5599_s3 + $0x38] sm:$0xff]  }
 0x7bf   :  { %v2877_v51 = vsub.f32 %v2875_v48, %v2876_v50 }
 0x7c1   :  { %v2878_v53 = vmax.f32 %v2877_v51, 0.0 }
 0x7c3   :  { %v2880_v54 = vadd.f32 1e-05, %v2878_v53 }
 0x7c5   :  { %4342 = vrsqrt.f32 %v2880_v54 }
 0x7cf   :  { %v4343_v56 = vpop.eup %4342 }
 0x7d0   :  { %v2882_v58 = vmul.f32 %v4343_v56, %v2879_v55 }
 0x7d2   :  { %v2890_v40 = vmul.f32 %v3615_v57, %v2882_v58 }
 0x7d4   :  { %v2898_v59 = vadd.f32 %v3616_v41, %v2890_v40 }
 0x7d6   :  { %v2899_v60 = vmax.f32 %v2898_v59, 0.0 }
 0x7d8   :  { %v2900_v44 = vpack.c.bf16 %v2899_v60, %v2899_v60 }
 0x7da   :  { %3971 = vmatmul.mubr.bf16.vlgmr.msra.gmra.mrb[24].mxu1 %v2900_v44 }
 0x7db   :  { %4010 = vmatprep.mubr.msk.bf16.mxu1 %vm5038_vm2, %v5037_v42  ;;  %3995 = vmatpush3.bf16.msra.mxu1 %v4334_v35 }
 0x7dc   :  { %3996 = vmatprep.subr.bf16.mxu1 %v5037_v42 }
 0x7df   :  { %3997 = vmatpush3.bf16.msra.mxu1 %v4335_v36 }
 0x7e0   :  { %3998 = vmatprep.subr.bf16.mxu1 %v5037_v42 }
 0x7e3   :  { %3999 = vmatpush3.bf16.msra.mxu1 %v4336_v38 }
 0x7e4   :  { %4000 = vmatprep.subr.bf16.mxu1 %v5037_v42 }
 0x7e7   :  { %4001 = vmatpush3.bf16.msra.mxu1 %v4337_v5 }
 0x7e8   :  { %4002 = vmatprep.subr.bf16.mxu1 %v5037_v42 }
 0x7eb   :  { %4003 = vmatpush3.bf16.msra.mxu1 %v4338_v43 }
 0x7ec   :  { %4004 = vmatprep.subr.bf16.mxu1 %v5037_v42 }
 0x7ef   :  { %4005 = vmatpush3.bf16.msra.mxu1 %v4339_v25 }
 0x7f0   :  { %4006 = vmatprep.subr.bf16.mxu1 %v5037_v42 }
 0x7f3   :  { %4007 = vmatpush3.bf16.msra.mxu1 %v4340_v45 }
 0x7f4   :  { %4008 = vmatprep.subr.bf16.mxu1 %v5037_v42 }
 0x7f7   :  { %4009 = vmatpush3.bf16.msra.mxu1 %v4341_v46 }
 0x8ad   :  { %v2999_v3 = vpop.f32.mrb[24].mxu1 }
 0x8ae   :  { %v3005_v4 = vrot.slane %v2999_v3, 4  ;;  %v3012_v6 = vmul.f32 %v2999_v3, %v2999_v3  ;;  %v3972_v7 = vpop.f32.mrb[25].mxu1 }
 0x8af   :  { %v3002_v8 = vpop.f32.mrb[26].mxu1  ;;  %v3636_v7 = vld [vmem:[#allocation37] ss:$0 sm:$0xff] }
 0x8b0   :  { %v3006_v9 = vadd.f32 %v3005_v4, %v2999_v3  ;;  %v3013_v10 = vrot.slane %v3012_v6, 4  ;;  %v3973_v11 = vpop.f32.mrb[27].mxu1  ;;  %v3635_v4 = vld [vmem:[#allocation35] ss:$0 sm:$0xff] }
 0x8b2   :  { %v3007_v12 = vrot.slane %v3006_v9, 2  ;;  %v3014_v37 = vadd.f32 %v3013_v10, %v3012_v6 }
 0x8b4   :  { %v3008_v39 = vadd.f32 %v3007_v12, %v3006_v9  ;;  %v3015_v13 = vrot.slane %v3014_v37, 2 }
 0x8b6   :  { %v3009_v14 = vrot.slane %v3008_v39, 1  ;;  %v3016_v63 = vadd.f32 %v3015_v13, %v3014_v37 }
 0x8b8   :  { %v3010_v15 = vadd.f32 %v3009_v14, %v3008_v39  ;;  %v3017_v19 = vrot.slane %v3016_v63, 1 }
 0x8ba   :  { %v3011_v16 = vmul.f32 0.125, %v3010_v15  ;;  %v3018_v17 = vadd.f32 %v3017_v19, %v3016_v63 }
 0x8bc   :  { %v3019_v18 = vmul.f32 0.125, %v3018_v17  ;;  %v3020_v20 = vmul.f32 %v3011_v16, %v3011_v16  ;;  %v3023_v26 = vsub.f32 %v2999_v3, %v3011_v16 }
 0x8be   :  { %v3021_v21 = vsub.f32 %v3019_v18, %v3020_v20 }
 0x8c0   :  { %v3022_v22 = vmax.f32 %v3021_v21, 0.0 }
 0x8c2   :  { %v3024_v23 = vadd.f32 1e-05, %v3022_v22 }
 0x8c4   :  { %4344 = vrsqrt.f32 %v3024_v23 }
 0x8ce   :  { %v4345_v27 = vpop.eup %4344 }
 0x8cf   :  { %v3026_v29 = vmul.f32 %v4345_v27, %v3023_v26 }
 0x8d1   :  { %v3034_v31 = vmul.f32 %v3625_v28, %v3026_v29 }
 0x8d3   :  { %v3042_v32 = vadd.f32 %v3626_v30, %v3034_v31 }
 0x8d5   :  { %v3043_v33 = vmax.f32 %v3042_v32, 0.0 }
 0x8d7   :  { %v3044_v34 = vpack.c.bf16 %v3043_v33, %v3043_v33 }
 0x8d9   :  { %3991 = vmatmul.mubr.bf16.vlgmr.msra.gmra.mrb[28].mxu0 %v3044_v34 }
 0x9ac   :  { %v3143_v47 = vpop.f32.mrb[28].mxu0 }
 0x9ad   :  { %v3149_v48 = vrot.slane %v3143_v47, 4  ;;  %v3156_v50 = vmul.f32 %v3143_v47, %v3143_v47  ;;  %v3992_v51 = vpop.f32.mrb[29].mxu0 }
 0x9ae   :  { %v3146_v53 = vpop.f32.mrb[30].mxu0 }
 0x9af   :  { %v3150_v54 = vadd.f32 %v3149_v48, %v3143_v47  ;;  %v3157_v55 = vrot.slane %v3156_v50, 4  ;;  %v3993_v56 = vpop.f32.mrb[31].mxu0 }
 0x9b1   :  { %v3151_v57 = vrot.slane %v3150_v54, 2  ;;  %v3158_v58 = vadd.f32 %v3157_v55, %v3156_v50 }
 0x9b3   :  { %v3152_v41 = vadd.f32 %v3151_v57, %v3150_v54  ;;  %v3159_v40 = vrot.slane %v3158_v58, 2 }
 0x9b5   :  { %v3153_v59 = vrot.slane %v3152_v41, 1  ;;  %v3160_v60 = vadd.f32 %v3159_v40, %v3158_v58 }
 0x9b7   :  { %v3154_v44 = vadd.f32 %v3153_v59, %v3152_v41  ;;  %v3161_v24 = vrot.slane %v3160_v60, 1 }
 0x9b9   :  { %v3155_v49 = vmul.f32 0.125, %v3154_v44  ;;  %v3162_v61 = vadd.f32 %v3161_v24, %v3160_v60 }
 0x9bb   :  { %v3163_v42 = vmul.f32 0.125, %v3162_v61  ;;  %v3164_v52 = vmul.f32 %v3155_v49, %v3155_v49  ;;  %v3167_v2 = vsub.f32 %v3143_v47, %v3155_v49 }
 0x9bd   :  { %v3165_v62 = vsub.f32 %v3163_v42, %v3164_v52 }
 0x9bf   :  { %v3166_v0 = vmax.f32 %v3165_v62, 0.0 }
 0x9c1   :  { %v3168_v1 = vadd.f32 1e-05, %v3166_v0 }
 0x9c3   :  { %4346 = vrsqrt.f32 %v3168_v1 }
 0x9cd   :  { %v4347_v3 = vpop.eup %4346 }
 0x9ce   :  { %v3170_v6 = vmul.f32 %v4347_v3, %v3167_v2 }
 0x9d0   :  { %v3178_v8 = vmul.f32 %v3635_v4, %v3170_v6 }
 0x9d2   :  { %v3186_v9 = vadd.f32 %v3636_v7, %v3178_v8 }
 0x9d4   :  { %v3187_v10 = vmax.f32 %v3186_v9, 0.0 }
 0x9d6   :  { %v3188_v11 = vpack.c.bf16 %v3187_v10, %v3187_v10 }
 0x9d8   :  { %4011 = vmatmul.mubr.bf16.vlgmr.msra.gmra.mrb[28].mxu1 %v3188_v11 }
 0x9d9   :  { %4891 = shalt.err (!%p4888_p0)
}
 0x9da   :  { %s4892_s1 = scalar_lea.hbm %s5207_s5, 128 }
 0x9db   :  { %p4893_p1 = scmp.ne.s32.totalorder %s5207_s5, %s4892_s1  ;;  %p4896_p2 = scmp.lt.u32.totalorder %s4892_s1, %s5207_s5 }
 0x9dd   :  { %p4898_p3 = pnand %p4896_p2, %p4893_p1 }
 0x9df   :  { %4901 = shalt.err (!%p4898_p3)
}
 0x9e0   :  { %3326 = dma.vmem_to_hbm [thread:$0]  %s3324_s29, 128, %s5207_s5, [#allocation42]  }
 0x9e1   :  { %s5042_s2 = smov [#allocation43]  }
 0x9e2   :  { %s3333_s11 = sshll.u32 %s5042_s2, 4  ;;  %s3334_s11 = int_to_ptr.vmem [resolvable:$true] %s3333_s11 }
 0x9e3   :  { %s4902_s4 = scalar_lea.vmem %s3334_s11, 128  ;;  %p4907_p5 = scmp.lt.s32.totalorder %s3334_s11, %s3334_s11 }
 0x9e4   :  { %p4903_p4 = scmp.ne.s32.totalorder %s3334_s11, %s4902_s4  ;;  %p4908_p6 = scmp.lt.s32.totalorder %s4902_s4, %s4902_s4 }
 0x9e6   :  { %p4909_p7 = por %p4908_p6, %p4907_p5 }
 0x9e8   :  { %p4910_p8 = pnand %p4909_p7, %p4903_p4 }
 0x9ea   :  { %4913 = shalt.err (!%p4910_p8)
}
 0x9eb   :  { %s4914_s15 = scalar_lea.hbm %s5212_s12, 128 }
 0x9ec   :  { %p4915_p9 = scmp.ne.s32.totalorder %s5212_s12, %s4914_s15  ;;  %p4918_p10 = scmp.lt.u32.totalorder %s4914_s15, %s5212_s12 }
 0x9ee   :  { %p4920_p11 = pnand %p4918_p10, %p4915_p9 }
 0x9f0   :  { %4923 = shalt.err (!%p4920_p11)
}
 0x9f1   :  { %3336 = dma.vmem_to_hbm [thread:$0]  %s3334_s11, 128, %s5212_s12, [#allocation42]   ;;  %v3637_v12 = vld [vmem:[#allocation38] ss:$0 sm:$0xff] }
 0x9f2   :  { %s5043_s5 = smov [#allocation40]  }
 0x9f3   :  { %s3313_s9 = sshll.u32 %s5043_s5, 4  ;;  %s3314_s9 = int_to_ptr.vmem [resolvable:$true] %s3313_s9 }
 0x9f4   :  { %s4924_s7 = scalar_lea.vmem %s3314_s9, 128  ;;  %p4929_p13 = scmp.lt.s32.totalorder %s3314_s9, %s3314_s9 }
 0x9f5   :  { %p4925_p12 = scmp.ne.s32.totalorder %s3314_s9, %s4924_s7  ;;  %p4930_p0 = scmp.lt.s32.totalorder %s4924_s7, %s4924_s7 }
 0x9f7   :  { %p4931_p1 = por %p4930_p0, %p4929_p13 }
 0x9f9   :  { %p4932_p2 = pnand %p4931_p1, %p4925_p12 }
 0xaab   :  { %v3294_v37 = vpop.f32.mrb[28].mxu1 }
 0xaac   :  { %v3295_v39 = vadd.f32 %v3637_v12, %v3294_v37  ;;  %v4012_v13 = vpop.f32.mrb[29].mxu1 }
 0xaad   :  { %v3297_v14 = vpop.f32.mrb[30].mxu1 }
 0xaae   :  { %v3646_v63 = vmul.f32 -1.442695, %v3295_v39  ;;  %v4013_v15 = vpop.f32.mrb[31].mxu1 }
 0xab0   :  { %4348 = vpow2.f32 %v3646_v63 }
 0xaba   :  { %v4349_v19 = vpop.eup %4348 }
 0xabb   :  { %v3303_v16 = vadd.f32 1.0, %v4349_v19 }
 0xabd   :  { %4350 = vrcp.f32 %v3303_v16 }
 0xac7   :  { %v4351_v17 = vpop.eup %4350 }
 0xac8   :  { %3306 = vst.msk [vmem:[#allocation40] sm:$0xff] %vm1128_vm4, %v4351_v17 }
 0xac9   :  { %4935 = shalt.err (!%p4932_p2)
}
 0xaca   :  { %s4936_s12 = scalar_lea.hbm %s5202_s30, 128 }
 0xacb   :  { %p4937_p3 = scmp.ne.s32.totalorder %s5202_s30, %s4936_s12  ;;  %p4940_p4 = scmp.lt.u32.totalorder %s4936_s12, %s5202_s30 }
 0xacd   :  { %p4942_p5 = pnand %p4940_p4, %p4937_p3 }
 0xacf   :  { %4945 = shalt.err (!%p4942_p5)
}
 0xad0   :  { %3316 = dma.vmem_to_hbm [thread:$0]  %s3314_s9, 128, %s5202_s30, [#allocation7]  }
 0xad1   :  { %4974 = dma.done.wait [#allocation7], 128  }
 0xad2   :  { %4975 = vsyncadd [#allocation7], 4294967168 }
 0xad3   :  { %4976 = dma.done.wait [#allocation42], 256  }
 0xad4   :  { %4977 = vsyncadd [#allocation42], 4294967040 }
 0xad5   :  { %3346 = vsyncpa [#allocation6], 1 }
 0xad6   :  { %3347 = vsyncpa [#allocation9], 1 }
 0xad7   :  { %3348 = vsyncpa [#allocation12], 1 }
 0xad8   :  { %3349 = vsyncpa [#allocation15], 1 }
 0xad9   :  { %3350 = vsyncpa [#allocation18], 1 }
 0xada   :  { %3351 = vsyncpa [#allocation21], 1 }
 0xadb   :  { %3352 = vsyncpa [#allocation24], 1 }
 0xadc   :  { %3353 = vsyncpa [#allocation27], 1 }
 0xadd   :  { %3354 = vsyncpa [#allocation30], 1 }
 0xade   :  { %3355 = vsyncpa [#allocation33], 1 }
 0xadf   :  { %3356 = vsyncpa [#allocation36], 1 }
 0xae0   :  { %3357 = vsyncpa [#allocation39], 1 }
 0xae1   :  { %3358 = vsyncpa [#allocation7], 1 }
 0xae2   :  { %3359 = vsyncpa [#allocation42], 1 }
 0xae3   :  { %3360 = vsyncmov [#allocation4] }
 0xae6   :  { %s3361_s30 = vpop.sfrf %3360 }
 0xae7   :  { %p3647_p6 = scmp.ne.s32.totalorder %s3361_s30, 0 }
 0xae9   :  { %3365 = shalt.err (%p3647_p6)  }
 0xaea   :  { %3367 = vsyncmov [#allocation4 + $0x1] }
 0xaed   :  { %s3368_s10 = vpop.sfrf %3367 }
 0xaee   :  { %p3648_p7 = scmp.ne.s32.totalorder %s3368_s10, 0 }
 0xaf0   :  { %3372 = shalt.err (%p3648_p7)  }

</bundles_post_ra>
